<compile_context>
chip_gen: v6e
topology: v6e:2x2x1
jax: 0.10.0
libtpu: 0.0.40
codegen_flags: <defaults>
</compile_context>

<pallas_src>
import functools

import jax
import jax.numpy as jnp
from jax import lax
from jax.experimental import pallas as pl
from jax.experimental.pallas import tpu as pltpu

EPS = 1e-3  # nn.BatchNorm2d(eps=0.001)


# ---------------------------------------------------------------------------
# Small helpers
# ---------------------------------------------------------------------------
def _vmem_spec():
    return pl.BlockSpec(memory_space=pltpu.MemorySpace.VMEM)


def _smem_spec():
    return pl.BlockSpec(memory_space=pltpu.MemorySpace.SMEM)


@functools.lru_cache(maxsize=None)
def _vmem_limit_bytes():
    """Generation-aware VMEM budget: ~75% of physical per-core VMEM.

    v5e/v6e (128 MiB) -> 96 MiB; v7x (64 MiB) -> 48 MiB (leaves headroom for
    Mosaic internal scratch and double-buffering).
    """
    phys = 64 * 1024 * 1024
    try:
        phys = int(pltpu.get_tpu_info().vmem_capacity_bytes)
    except Exception:
        pass  # unknown chip / emulator: keep the conservative default
    return max(32 * 1024 * 1024, (phys * 3) // 4)


def _compiler_params(axes):
    return pltpu.CompilerParams(dimension_semantics=axes,
                                vmem_limit_bytes=_vmem_limit_bytes())


def _partial_moments(x2d):
    """(C, cols) f32 -> (C, 8): col0 = sum, col1 = sum of squares, rest 0."""
    c = x2d.shape[0]
    s = jnp.sum(x2d, axis=1, keepdims=True)
    ss = jnp.sum(x2d * x2d, axis=1, keepdims=True)
    return jnp.concatenate([s, ss, jnp.zeros((c, 6), jnp.float32)], axis=1)


# ---------------------------------------------------------------------------
# Pallas kernels (everything channel-major: rows of the image sit on lanes)
# ---------------------------------------------------------------------------
def _in_conv_kernel(x_ref, w_ref, h1_ref, st_ref):
    """1x1 input conv on a (Cin, tm) column tile + BN1 partial moments."""
    h = jnp.dot(w_ref[...], x_ref[...], preferred_element_type=jnp.float32)
    h1_ref[...] = h.astype(h1_ref.dtype)
    st_ref[0] = _partial_moments(h)


def _mid_conv_kernel(h1_ref, s1_ref, t1_ref, a1_ref, wmid_ref, bmid_ref,
                     h2_ref, st_ref):
    """BN1-apply + PReLU + fused 3x3 conv (+bias) for one image plane.

    h1_ref  : (Cmid, 1, H, W)  raw h1 of image n (channel-major)
    wmid_ref: (Cmid, 9*Cmid)   [co, (ky, kx, ci)] weights
    h2_ref  : (Cmid, H*W)      columns n*H*W .. (n+1)*H*W of h2^T
    """
    c, _, hh, ww = h1_ref.shape
    a = h1_ref[...].reshape(c, hh, ww).astype(jnp.float32)
    a = a * s1_ref[...] + t1_ref[...]                 # folded BN1 scale/shift
    a = jnp.where(a >= 0.0, a, a1_ref[0] * a)         # PReLU (scalar from SMEM)

    # In-kernel zero padding (replaces the old HBM pad round trip + ring mask).
    zc = jnp.zeros((c, hh, 1), jnp.float32)
    zr = jnp.zeros((c, 1, ww + 2), jnp.float32)
    ap = jnp.concatenate([zc, a, zc], axis=2)         # (C, H,   W+2)
    ap = jnp.concatenate([zr, ap, zr], axis=1)        # (C, H+2, W+2)

    # One GEMM with K = 9*Cmid instead of 9 tiny-K GEMMs + 8 accumulator adds.
    wins = [ap[:, dy:dy + hh, dx:dx + ww].reshape(c, hh * ww)
            for dy in range(3) for dx in range(3)]
    slab = jnp.concatenate(wins, axis=0)              # (9*Cmid, H*W)
    acc = jnp.dot(wmid_ref[...], slab,
                  preferred_element_type=jnp.float32) + bmid_ref[...]
    h2_ref[...] = acc.astype(h2_ref.dtype)
    st_ref[0] = _partial_moments(acc)


def _out_stats_kernel(h2_ref, s2_ref, t2_ref, a2_ref, w_ref, st_ref):
    """BN2-apply + PReLU + 1x1 output conv; emit BN3 partial moments only."""
    a = h2_ref[...] * s2_ref[...] + t2_ref[...]
    a = jnp.where(a >= 0.0, a, a2_ref[0] * a)
    y = jnp.dot(w_ref[...], a, preferred_element_type=jnp.float32)
    st_ref[0] = _partial_moments(y)


def _final_kernel(h2_ref, s2_ref, t2_ref, a2_ref, wf_ref, t3_ref, o_ref):
    """BN2-apply + PReLU + 1x1 output conv with BN3 folded into weight/bias."""
    a = h2_ref[...] * s2_ref[...] + t2_ref[...]
    a = jnp.where(a >= 0.0, a, a2_ref[0] * a)
    o_ref[...] = (jnp.dot(wf_ref[...], a, preferred_element_type=jnp.float32)
                  + t3_ref[...]).astype(o_ref.dtype)


# ---------------------------------------------------------------------------
# Wrapper helpers
# ---------------------------------------------------------------------------
def _reduce_moments(partials, count):
    """partials: (tiles, C, 8). Returns per-channel (mean, biased var)."""
    total = jnp.sum(partials[:, :, 0], axis=0)
    total_sq = jnp.sum(partials[:, :, 1], axis=0)
    mean = total / count
    var = jnp.maximum(total_sq / count - mean * mean, 0.0)
    return mean, var


def _bn_scale_shift(mean, var, gamma, beta):
    s = gamma * lax.rsqrt(var + EPS)
    return s, beta - mean * s


def _pick_row_tile(m, nch, budget_bytes=8 * 1024 * 1024):
    """Largest multiple-of-128 divisor of m whose f32 blocks fit the budget."""
    if m % 128 != 0:
        # Odd sizes: single block (small models only; realistic ENet shapes
        # always have N*H*W % 128 == 0).
        return m
    cap = budget_bytes // (4 * max(nch, 1))
    cap = max(128, min(32768, (cap // 128) * 128, m))
    t = cap
    while t >= 128:
        if m % t == 0:
            return t
        t -= 128
    return 128


# ---------------------------------------------------------------------------
# Public wrapper (accepts / returns NCHW, matching the PyTorch module)
# ---------------------------------------------------------------------------
def enet_decoder_main_path(x_nchw, p, *, row_tile=None,
                           interm_dtype=jnp.float32):
    """upsample=False main path, training-mode BatchNorm semantics.

    interm_dtype=jnp.bfloat16 halves the HBM traffic of x/h1/h2 (moment
    accumulation and all BN math stay in f32), at a small accuracy cost.
    """
    N, Cin, H, W = x_nchw.shape
    Cmid = p["w_in"].shape[0]
    Cout = p["w_out"].shape[0]
    M = N * H * W
    HW = H * W
    # Pass 2 writes one (Cmid, H*W) column block per image into (Cmid, M).
    assert N == 1 or HW % 128 == 0, "need H*W % 128 == 0 when batch > 1"

    if (row_tile is not None and M % row_tile == 0
            and (row_tile % 128 == 0 or row_tile == M)):
        tm = row_tile
    else:
        tm = _pick_row_tile(M, Cin + Cmid + Cout)
    mt = M // tm

    f32 = jnp.float32
    # Channel-major / lane-dense working layout: (C, rows), rows on lanes.
    x2d = jnp.transpose(x_nchw, (1, 0, 2, 3)).reshape(Cin, M).astype(interm_dtype)

    # Parameter re-layout (pure glue).
    w_in = p["w_in"][:, :, 0, 0].astype(f32)                       # (Cmid, Cin)
    w_mid = jnp.transpose(p["w_mid"], (0, 2, 3, 1)).reshape(
        Cmid, 9 * Cmid).astype(f32)                                # (co, ky kx ci)
    w_out = p["w_out"][:, :, 0, 0].astype(f32)                     # (Cout, Cmid)
    b_mid = p["b_mid"].reshape(Cmid, 1).astype(f32)
    a1 = p["a1"].reshape(1).astype(f32)                            # PReLU scalars
    a2 = p["a2"].reshape(1).astype(f32)

    # ---- pass 1: 1x1 input conv + BN1 partial moments ----------------------
    h1, st1 = pl.pallas_call(
        _in_conv_kernel,
        grid=(mt,),
        in_specs=[pl.BlockSpec((Cin, tm), lambda i: (0, i)),
                  pl.BlockSpec((Cmid, Cin), lambda i: (0, 0))],     # resident
        out_specs=(pl.BlockSpec((Cmid, tm), lambda i: (0, i)),
                   pl.BlockSpec((1, Cmid, 8), lambda i: (i, 0, 0))),
        out_shape=(jax.ShapeDtypeStruct((Cmid, M), interm_dtype),
                   jax.ShapeDtypeStruct((mt, Cmid, 8), f32)),
        compiler_params=_compiler_params(("parallel",)),
    )(x2d, w_in)

    mean1, var1 = _reduce_moments(st1, float(M))
    s1, t1 = _bn_scale_shift(mean1, var1, p["g1"].astype(f32), p["b1"].astype(f32))

    # ---- pass 2: BN1 + PReLU + fused 3x3 conv + BN2 partial moments ---------
    h14 = h1.reshape(Cmid, N, H, W)                     # free reshape
    h2, st2 = pl.pallas_call(
        _mid_conv_kernel,
        grid=(N,),
        in_specs=[pl.BlockSpec((Cmid, 1, H, W), lambda n: (0, n, 0, 0)),
                  _vmem_spec(),      # s1  (Cmid, 1, 1)
                  _vmem_spec(),      # t1  (Cmid, 1, 1)
                  _smem_spec(),      # PReLU alpha1 (scalar)
                  _vmem_spec(),      # fused 3x3 weights (Cmid, 9*Cmid)
                  _vmem_spec()],     # conv bias (Cmid, 1)
        out_specs=(pl.BlockSpec((Cmid, HW), lambda n: (0, n)),
                   pl.BlockSpec((1, Cmid, 8), lambda n: (n, 0, 0))),
        out_shape=(jax.ShapeDtypeStruct((Cmid, M), interm_dtype),
                   jax.ShapeDtypeStruct((N, Cmid, 8), f32)),
        compiler_params=_compiler_params(("parallel",)),
    )(h14, s1.reshape(Cmid, 1, 1), t1.reshape(Cmid, 1, 1), a1, w_mid, b_mid)

    mean2, var2 = _reduce_moments(st2, float(M))
    s2, t2 = _bn_scale_shift(mean2, var2, p["g2"].astype(f32), p["b2"].astype(f32))
    s2c, t2c = s2.reshape(Cmid, 1), t2.reshape(Cmid, 1)

    # ---- pass 3: BN2 + PReLU + 1x1 output conv -> BN3 partial moments -------
    st3 = pl.pallas_call(
        _out_stats_kernel,
        grid=(mt,),
        in_specs=[pl.BlockSpec((Cmid, tm), lambda i: (0, i)),
                  _vmem_spec(), _vmem_spec(), _smem_spec(),
                  pl.BlockSpec((Cout, Cmid), lambda i: (0, 0))],
        out_specs=pl.BlockSpec((1, Cout, 8), lambda i: (i, 0, 0)),
        out_shape=jax.ShapeDtypeStruct((mt, Cout, 8), f32),
        compiler_params=_compiler_params(("parallel",)),
    )(h2, s2c, t2c, a2, w_out)

    mean3, var3 = _reduce_moments(st3, float(M))
    s3, t3 = _bn_scale_shift(mean3, var3, p["g3"].astype(f32), p["b3"].astype(f32))

    # ---- pass 4: recompute with BN3 folded into the output weight/bias ------
    w_out_f = w_out * s3.reshape(Cout, 1)
    y2d = pl.pallas_call(
        _final_kernel,
        grid=(mt,),
        in_specs=[pl.BlockSpec((Cmid, tm), lambda i: (0, i)),
                  _vmem_spec(), _vmem_spec(), _smem_spec(),
                  pl.BlockSpec((Cout, Cmid), lambda i: (0, 0)),
                  _vmem_spec()],
        out_specs=pl.BlockSpec((Cout, tm), lambda i: (0, i)),
        out_shape=jax.ShapeDtypeStruct((Cout, M), f32),
        compiler_params=_compiler_params(("parallel",)),
    )(h2, s2c, t2c, a2, w_out_f, t3.reshape(Cout, 1))

    return jnp.transpose(y2d.reshape(Cout, N, H, W), (1, 0, 2, 3))


# ---------------------------------------------------------------------------
# Deterministic parameter init (shapes exactly as in the PyTorch __init__)
# ---------------------------------------------------------------------------
def init_params(key, input_channels, output_channels):
    cmid = output_channels // 4
    ks = jax.random.split(key, 12)

    def nrm(k, shape, scale):
        return scale * jax.random.normal(k, shape, jnp.float32)

    return dict(
        w_in=nrm(ks[0], (cmid, input_channels, 1, 1), 0.5),
        g1=1.0 + 0.1 * jax.random.normal(ks[1], (cmid,), jnp.float32),
        b1=nrm(ks[2], (cmid,), 0.1),
        a1=jnp.array(0.25, jnp.float32),                 # nn.PReLU() default
        w_mid=nrm(ks[3], (cmid, cmid, 3, 3), 0.3),
        b_mid=nrm(ks[4], (cmid,), 0.1),
        g2=1.0 + 0.1 * jax.random.normal(ks[5], (cmid,), jnp.float32),
        b2=nrm(ks[6], (cmid,), 0.1),
        a2=jnp.array(0.25, jnp.float32),
        w_out=nrm(ks[7], (output_channels, cmid, 1, 1), 0.5),
        g3=1.0 + 0.1 * jax.random.normal(ks[8], (output_channels,), jnp.float32),
        b3=nrm(ks[9], (output_channels,), 0.1),
    )


# ---------------------------------------------------------------------------
# Pure-JAX reference (mirrors the PyTorch forward in training mode)
# ---------------------------------------------------------------------------
def reference(x_nchw, p):
    def bn(x, g, b):
        mean = jnp.mean(x, axis=(0, 2, 3), keepdims=True)
        var = jnp.mean(jnp.square(x - mean), axis=(0, 2, 3), keepdims=True)
        return (x - mean) * lax.rsqrt(var + EPS) * g.reshape(1, -1, 1, 1) \
            + b.reshape(1, -1, 1, 1)

    def prelu(x, a):
        return jnp.where(x >= 0.0, x, a * x)

    dn = ("NCHW", "OIHW", "NCHW")
    h = lax.conv_general_dilated(x_nchw, p["w_in"], (1, 1), "VALID",
                                 dimension_numbers=dn)
    h = prelu(bn(h, p["g1"], p["b1"]), p["a1"])
    h = lax.conv_general_dilated(h, p["w_mid"], (1, 1), ((1, 1), (1, 1)),
                                 dimension_numbers=dn)
    h = h + p["b_mid"].reshape(1, -1, 1, 1)
    h = prelu(bn(h, p["g2"], p["b2"]), p["a2"])
    y = lax.conv_general_dilated(h, p["w_out"], (1, 1), "VALID",
                                 dimension_numbers=dn)
    return bn(y, p["g3"], p["b3"])


if __name__ == "__main__":
    key = jax.random.PRNGKey(0)
    kx, kp = jax.random.split(key)

    N, Cin, Cout, H, W = 2, 8, 16, 16, 16        # internal_channels = Cout//4 = 4
    x = jax.random.normal(kx, (N, Cin, H, W), jnp.float32)
    params = init_params(kp, Cin, Cout)

    # row_tile=128 exercises multi-tile grids and the cross-tile BN reduction.
    fwd = jax.jit(functools.partial(enet_decoder_main_path, row_tile=128))
    out = jax.block_until_ready(fwd(x, params))

    ref = reference(x, params)
    err = float(jnp.max(jnp.abs(out - ref)))
    assert out.shape == (N, Cout, H, W), out.shape
    assert err < 1e-3, f"max abs err = {err}"
    print("KERNEL_OK")
</pallas_src>

<mosaic_0001>
module attributes {stable_mosaic.version = 11 : i64} {
  func.func @_in_conv_kernel(%arg0: i32, %arg1: memref<8x128xf32, #tpu.memory_space<vmem>>, %arg2: memref<4x8xf32, #tpu.memory_space<vmem>>, %arg3: memref<4x128xf32, #tpu.memory_space<vmem>>, %arg4: memref<1x4x8xf32, #tpu.memory_space<vmem>>) attributes {dimension_semantics = [#tpu.dimension_semantics<parallel>], iteration_bounds = array<i64: 4>, scalar_prefetch = 0 : i64, scratch_operands = 0 : i64, tpu.core_type = #tpu.core_type<tc>, window_params = [{transform_indices = @transform_0, window_bounds = array<i64: 8, 128>}, {pipeline_mode = #tpu.pipeline_mode<synchronous>, transform_indices = @transform_1, window_bounds = array<i64: 4, 8>}, {transform_indices = @transform_2, window_bounds = array<i64: 4, 128>}, {transform_indices = @transform_3, window_bounds = array<i64: 1, 4, 8>}]} {
    %c0 = arith.constant 0 : index
    %c0_0 = arith.constant 0 : index
    %0 = vector.load %arg2[%c0, %c0_0] : memref<4x8xf32, #tpu.memory_space<vmem>>, vector<4x8xf32>
    %c0_1 = arith.constant 0 : index
    %c0_2 = arith.constant 0 : index
    %1 = vector.load %arg1[%c0_1, %c0_2] : memref<8x128xf32, #tpu.memory_space<vmem>>, vector<8x128xf32>
    %cst = arith.constant dense<0.000000e+00> : vector<4x128xf32>
    %2 = tpu.matmul %0, %1, %cst {dimension_numbers = #tpu.dot_dimension_numbers<[1], [0], [0], [1], [0, 0, 1, 1], [], []>} : vector<4x8xf32>, vector<8x128xf32>, vector<4x128xf32> -> vector<4x128xf32>
    %c0_3 = arith.constant 0 : index
    %c0_4 = arith.constant 0 : index
    %3 = vector.load %arg3[%c0_3, %c0_4] : memref<4x128xf32, #tpu.memory_space<vmem>>, vector<4x128xf32>
    tpu.vector_store %arg3[%c0_3, %c0_4], %2 {strides = array<i32>} : memref<4x128xf32, #tpu.memory_space<vmem>>, vector<4x128xf32>,
    %cst_5 = arith.constant dense<0.000000e+00> : vector<4xf32>
    %4 = vector.multi_reduction <add>, %2, %cst_5 [1] : vector<4x128xf32> to vector<4xf32>
    %5 = vector.shape_cast %4 : vector<4xf32> to vector<4x1xf32>
    %6 = arith.mulf %2, %2 : vector<4x128xf32>
    %cst_6 = arith.constant dense<0.000000e+00> : vector<4xf32>
    %7 = vector.multi_reduction <add>, %6, %cst_6 [1] : vector<4x128xf32> to vector<4xf32>
    %8 = vector.shape_cast %7 : vector<4xf32> to vector<4x1xf32>
    %cst_7 = arith.constant 0.000000e+00 : f32
    %9 = vector.broadcast %cst_7 : f32 to vector<4x6xf32>
    %10 = tpu.concatenate %5, %8, %9 in 1 : vector<4x1xf32>, vector<4x1xf32>, vector<4x6xf32> -> vector<4x8xf32>
    %c0_8 = arith.constant 0 : index
    %c0_9 = arith.constant 0 : index
    %c0_10 = arith.constant 0 : index
    %11 = vector.load %arg4[%c0_8, %c0_9, %c0_10] : memref<1x4x8xf32, #tpu.memory_space<vmem>>, vector<1x4x8xf32>
    %12 = vector.shape_cast %11 : vector<1x4x8xf32> to vector<4x8xf32>
    %13 = vector.shape_cast %10 : vector<4x8xf32> to vector<1x4x8xf32>
    tpu.vector_store %arg4[%c0_8, %c0_9, %c0_10], %13 {strides = array<i32>} : memref<1x4x8xf32, #tpu.memory_space<vmem>>, vector<1x4x8xf32>,
    return
  }
  func.func @transform_0(%arg0: i32) -> (i32, i32) {
    %c0_i32 = arith.constant 0 : i32
    %c0_i32_0 = arith.constant 0 : i32
    return %c0_i32, %arg0 : i32, i32
  }
  func.func @transform_1(%arg0: i32) -> (i32, i32) {
    %c0_i32 = arith.constant 0 : i32
    %c0_i32_0 = arith.constant 0 : i32
    %c0_i32_1 = arith.constant 0 : i32
    return %c0_i32, %c0_i32_0 : i32, i32
  }
  func.func @transform_2(%arg0: i32) -> (i32, i32) {
    %c0_i32 = arith.constant 0 : i32
    %c0_i32_0 = arith.constant 0 : i32
    return %c0_i32, %arg0 : i32, i32
  }
  func.func @transform_3(%arg0: i32) -> (i32, i32, i32) {
    %c0_i32 = arith.constant 0 : i32
    %c0_i32_0 = arith.constant 0 : i32
    %c0_i32_1 = arith.constant 0 : i32
    return %arg0, %c0_i32, %c0_i32_0 : i32, i32, i32
  }
}

module attributes {stable_mosaic.version = 11 : i64} {
  func.func @_mid_conv_kernel(%arg0: i32, %arg1: memref<4x1x16x16xf32, #tpu.memory_space<vmem>>, %arg2: memref<4x1x1xf32, #tpu.memory_space<vmem>>, %arg3: memref<4x1x1xf32, #tpu.memory_space<vmem>>, %arg4: memref<1xf32, #tpu.memory_space<smem>>, %arg5: memref<4x36xf32, #tpu.memory_space<vmem>>, %arg6: memref<4x1xf32, #tpu.memory_space<vmem>>, %arg7: memref<4x256xf32, #tpu.memory_space<vmem>>, %arg8: memref<1x4x8xf32, #tpu.memory_space<vmem>>) attributes {dimension_semantics = [#tpu.dimension_semantics<parallel>], iteration_bounds = array<i64: 2>, scalar_prefetch = 0 : i64, scratch_operands = 0 : i64, tpu.core_type = #tpu.core_type<tc>, window_params = [{transform_indices = @transform_0, window_bounds = array<i64: 4, 1, 16, 16>}, {pipeline_mode = #tpu.pipeline_mode<synchronous>, transform_indices = @transform_1, window_bounds = array<i64: 4, 1, 1>}, {pipeline_mode = #tpu.pipeline_mode<synchronous>, transform_indices = @transform_2, window_bounds = array<i64: 4, 1, 1>}, {transform_indices = @transform_3, window_bounds = array<i64: 1>}, {pipeline_mode = #tpu.pipeline_mode<synchronous>, transform_indices = @transform_4, window_bounds = array<i64: 4, 36>}, {pipeline_mode = #tpu.pipeline_mode<synchronous>, transform_indices = @transform_5, window_bounds = array<i64: 4, 1>}, {transform_indices = @transform_6, window_bounds = array<i64: 4, 256>}, {transform_indices = @transform_7, window_bounds = array<i64: 1, 4, 8>}]} {
    %c0 = arith.constant 0 : index
    %c0_0 = arith.constant 0 : index
    %c0_1 = arith.constant 0 : index
    %c0_2 = arith.constant 0 : index
    %0 = vector.load %arg1[%c0, %c0_0, %c0_1, %c0_2] : memref<4x1x16x16xf32, #tpu.memory_space<vmem>>, vector<4x1x16x16xf32>
    %1 = vector.shape_cast %0 : vector<4x1x16x16xf32> to vector<4x16x16xf32>
    %c0_3 = arith.constant 0 : index
    %c0_4 = arith.constant 0 : index
    %c0_5 = arith.constant 0 : index
    %2 = vector.load %arg2[%c0_3, %c0_4, %c0_5] : memref<4x1x1xf32, #tpu.memory_space<vmem>>, vector<4x1x1xf32>
    %3 = vector.broadcast %2 : vector<4x1x1xf32> to vector<4x16x16xf32>
    %4 = arith.mulf %1, %3 : vector<4x16x16xf32>
    %c0_6 = arith.constant 0 : index
    %c0_7 = arith.constant 0 : index
    %c0_8 = arith.constant 0 : index
    %5 = vector.load %arg3[%c0_6, %c0_7, %c0_8] : memref<4x1x1xf32, #tpu.memory_space<vmem>>, vector<4x1x1xf32>
    %6 = vector.broadcast %5 : vector<4x1x1xf32> to vector<4x16x16xf32>
    %7 = arith.addf %4, %6 : vector<4x16x16xf32>
    %cst = arith.constant 0.000000e+00 : f32
    %8 = vector.broadcast %cst : f32 to vector<4x16x16xf32>
    %9 = arith.cmpf oge, %7, %8 : vector<4x16x16xf32>
    %c0_9 = arith.constant 0 : index
    %10 = memref.load %arg4[%c0_9] : memref<1xf32, #tpu.memory_space<smem>>
    %11 = vector.broadcast %10 : f32 to vector<4x16x16xf32>
    %12 = arith.mulf %11, %7 : vector<4x16x16xf32>
    %13 = arith.select %9, %7, %12 : vector<4x16x16xi1>, vector<4x16x16xf32>
    %cst_10 = arith.constant 0.000000e+00 : f32
    %14 = vector.broadcast %cst_10 : f32 to vector<4x16x1xf32>
    %cst_11 = arith.constant 0.000000e+00 : f32
    %15 = vector.broadcast %cst_11 : f32 to vector<4x1x18xf32>
    %16 = tpu.concatenate %14, %13, %14 in 2 : vector<4x16x1xf32>, vector<4x16x16xf32>, vector<4x16x1xf32> -> vector<4x16x18xf32>
    %17 = tpu.concatenate %15, %16, %15 in 1 : vector<4x1x18xf32>, vector<4x16x18xf32>, vector<4x1x18xf32> -> vector<4x18x18xf32>
    %18 = vector.extract_strided_slice %17 {offsets = [0, 0, 0], sizes = [4, 16, 16], strides = [1, 1, 1]} : vector<4x18x18xf32> to vector<4x16x16xf32>
    %19 = vector.shape_cast %18 : vector<4x16x16xf32> to vector<4x256xf32>
    %20 = vector.extract_strided_slice %17 {offsets = [0, 0, 1], sizes = [4, 16, 16], strides = [1, 1, 1]} : vector<4x18x18xf32> to vector<4x16x16xf32>
    %21 = vector.shape_cast %20 : vector<4x16x16xf32> to vector<4x256xf32>
    %22 = vector.extract_strided_slice %17 {offsets = [0, 0, 2], sizes = [4, 16, 16], strides = [1, 1, 1]} : vector<4x18x18xf32> to vector<4x16x16xf32>
    %23 = vector.shape_cast %22 : vector<4x16x16xf32> to vector<4x256xf32>
    %24 = vector.extract_strided_slice %17 {offsets = [0, 1, 0], sizes = [4, 16, 16], strides = [1, 1, 1]} : vector<4x18x18xf32> to vector<4x16x16xf32>
    %25 = vector.shape_cast %24 : vector<4x16x16xf32> to vector<4x256xf32>
    %26 = vector.extract_strided_slice %17 {offsets = [0, 1, 1], sizes = [4, 16, 16], strides = [1, 1, 1]} : vector<4x18x18xf32> to vector<4x16x16xf32>
    %27 = vector.shape_cast %26 : vector<4x16x16xf32> to vector<4x256xf32>
    %28 = vector.extract_strided_slice %17 {offsets = [0, 1, 2], sizes = [4, 16, 16], strides = [1, 1, 1]} : vector<4x18x18xf32> to vector<4x16x16xf32>
    %29 = vector.shape_cast %28 : vector<4x16x16xf32> to vector<4x256xf32>
    %30 = vector.extract_strided_slice %17 {offsets = [0, 2, 0], sizes = [4, 16, 16], strides = [1, 1, 1]} : vector<4x18x18xf32> to vector<4x16x16xf32>
    %31 = vector.shape_cast %30 : vector<4x16x16xf32> to vector<4x256xf32>
    %32 = vector.extract_strided_slice %17 {offsets = [0, 2, 1], sizes = [4, 16, 16], strides = [1, 1, 1]} : vector<4x18x18xf32> to vector<4x16x16xf32>
    %33 = vector.shape_cast %32 : vector<4x16x16xf32> to vector<4x256xf32>
    %34 = vector.extract_strided_slice %17 {offsets = [0, 2, 2], sizes = [4, 16, 16], strides = [1, 1, 1]} : vector<4x18x18xf32> to vector<4x16x16xf32>
    %35 = vector.shape_cast %34 : vector<4x16x16xf32> to vector<4x256xf32>
    %36 = tpu.concatenate %19, %21, %23, %25, %27, %29, %31, %33, %35 in 0 : vector<4x256xf32>, vector<4x256xf32>, vector<4x256xf32>, vector<4x256xf32>, vector<4x256xf32>, vector<4x256xf32>, vector<4x256xf32>, vector<4x256xf32>, vector<4x256xf32> -> vector<36x256xf32>
    %c0_12 = arith.constant 0 : index
    %c0_13 = arith.constant 0 : index
    %37 = vector.load %arg5[%c0_12, %c0_13] : memref<4x36xf32, #tpu.memory_space<vmem>>, vector<4x36xf32>
    %cst_14 = arith.constant dense<0.000000e+00> : vector<4x256xf32>
    %38 = tpu.matmul %37, %36, %cst_14 {dimension_numbers = #tpu.dot_dimension_numbers<[1], [0], [0], [1], [0, 0, 1, 1], [], []>} : vector<4x36xf32>, vector<36x256xf32>, vector<4x256xf32> -> vector<4x256xf32>
    %c0_15 = arith.constant 0 : index
    %c0_16 = arith.constant 0 : index
    %39 = vector.load %arg6[%c0_15, %c0_16] : memref<4x1xf32, #tpu.memory_space<vmem>>, vector<4x1xf32>
    %40 = vector.broadcast %39 : vector<4x1xf32> to vector<4x256xf32>
    %41 = arith.addf %38, %40 : vector<4x256xf32>
    %c0_17 = arith.constant 0 : index
    %c0_18 = arith.constant 0 : index
    %42 = vector.load %arg7[%c0_17, %c0_18] : memref<4x256xf32, #tpu.memory_space<vmem>>, vector<4x256xf32>
    tpu.vector_store %arg7[%c0_17, %c0_18], %41 {strides = array<i32>} : memref<4x256xf32, #tpu.memory_space<vmem>>, vector<4x256xf32>,
    %cst_19 = arith.constant dense<0.000000e+00> : vector<4xf32>
    %43 = vector.multi_reduction <add>, %41, %cst_19 [1] : vector<4x256xf32> to vector<4xf32>
    %44 = vector.shape_cast %43 : vector<4xf32> to vector<4x1xf32>
    %45 = arith.mulf %41, %41 : vector<4x256xf32>
    %cst_20 = arith.constant dense<0.000000e+00> : vector<4xf32>
    %46 = vector.multi_reduction <add>, %45, %cst_20 [1] : vector<4x256xf32> to vector<4xf32>
    %47 = vector.shape_cast %46 : vector<4xf32> to vector<4x1xf32>
    %cst_21 = arith.constant 0.000000e+00 : f32
    %48 = vector.broadcast %cst_21 : f32 to vector<4x6xf32>
    %49 = tpu.concatenate %44, %47, %48 in 1 : vector<4x1xf32>, vector<4x1xf32>, vector<4x6xf32> -> vector<4x8xf32>
    %c0_22 = arith.constant 0 : index
    %c0_23 = arith.constant 0 : index
    %c0_24 = arith.constant 0 : index
    %50 = vector.load %arg8[%c0_22, %c0_23, %c0_24] : memref<1x4x8xf32, #tpu.memory_space<vmem>>, vector<1x4x8xf32>
    %51 = vector.shape_cast %50 : vector<1x4x8xf32> to vector<4x8xf32>
    %52 = vector.shape_cast %49 : vector<4x8xf32> to vector<1x4x8xf32>
    tpu.vector_store %arg8[%c0_22, %c0_23, %c0_24], %52 {strides = array<i32>} : memref<1x4x8xf32, #tpu.memory_space<vmem>>, vector<1x4x8xf32>,
    return
  }
  func.func @transform_0(%arg0: i32) -> (i32, i32, i32, i32) {
    %c0_i32 = arith.constant 0 : i32
    %c0_i32_0 = arith.constant 0 : i32
    %c0_i32_1 = arith.constant 0 : i32
    %c0_i32_2 = arith.constant 0 : i32
    return %c0_i32, %arg0, %c0_i32_0, %c0_i32_1 : i32, i32, i32, i32
  }
  func.func @transform_1(%arg0: i32) -> (i32, i32, i32) {
    %c0_i32 = arith.constant 0 : i32
    %c0_i32_0 = arith.constant 0 : i32
    %c0_i32_1 = arith.constant 0 : i32
    %c0_i32_2 = arith.constant 0 : i32
    return %c0_i32, %c0_i32_0, %c0_i32_1 : i32, i32, i32
  }
  func.func @transform_2(%arg0: i32) -> (i32, i32, i32) {
    %c0_i32 = arith.constant 0 : i32
    %c0_i32_0 = arith.constant 0 : i32
    %c0_i32_1 = arith.constant 0 : i32
    %c0_i32_2 = arith.constant 0 : i32
    return %c0_i32, %c0_i32_0, %c0_i32_1 : i32, i32, i32
  }
  func.func @transform_3(%arg0: i32) -> i32 {
    %c0_i32 = arith.constant 0 : i32
    %c0_i32_0 = arith.constant 0 : i32
    return %c0_i32 : i32
  }
  func.func @transform_4(%arg0: i32) -> (i32, i32) {
    %c0_i32 = arith.constant 0 : i32
    %c0_i32_0 = arith.constant 0 : i32
    %c0_i32_1 = arith.constant 0 : i32
    return %c0_i32, %c0_i32_0 : i32, i32
  }
  func.func @transform_5(%arg0: i32) -> (i32, i32) {
    %c0_i32 = arith.constant 0 : i32
    %c0_i32_0 = arith.constant 0 : i32
    %c0_i32_1 = arith.constant 0 : i32
    return %c0_i32, %c0_i32_0 : i32, i32
  }
  func.func @transform_6(%arg0: i32) -> (i32, i32) {
    %c0_i32 = arith.constant 0 : i32
    %c0_i32_0 = arith.constant 0 : i32
    return %c0_i32, %arg0 : i32, i32
  }
  func.func @transform_7(%arg0: i32) -> (i32, i32, i32) {
    %c0_i32 = arith.constant 0 : i32
    %c0_i32_0 = arith.constant 0 : i32
    %c0_i32_1 = arith.constant 0 : i32
    return %arg0, %c0_i32, %c0_i32_0 : i32, i32, i32
  }
}

module attributes {stable_mosaic.version = 11 : i64} {
  func.func @_out_stats_kernel(%arg0: i32, %arg1: memref<4x128xf32, #tpu.memory_space<vmem>>, %arg2: memref<4x1xf32, #tpu.memory_space<vmem>>, %arg3: memref<4x1xf32, #tpu.memory_space<vmem>>, %arg4: memref<1xf32, #tpu.memory_space<smem>>, %arg5: memref<16x4xf32, #tpu.memory_space<vmem>>, %arg6: memref<1x16x8xf32, #tpu.memory_space<vmem>>) attributes {dimension_semantics = [#tpu.dimension_semantics<parallel>], iteration_bounds = array<i64: 4>, scalar_prefetch = 0 : i64, scratch_operands = 0 : i64, tpu.core_type = #tpu.core_type<tc>, window_params = [{transform_indices = @transform_0, window_bounds = array<i64: 4, 128>}, {pipeline_mode = #tpu.pipeline_mode<synchronous>, transform_indices = @transform_1, window_bounds = array<i64: 4, 1>}, {pipeline_mode = #tpu.pipeline_mode<synchronous>, transform_indices = @transform_2, window_bounds = array<i64: 4, 1>}, {transform_indices = @transform_3, window_bounds = array<i64: 1>}, {pipeline_mode = #tpu.pipeline_mode<synchronous>, transform_indices = @transform_4, window_bounds = array<i64: 16, 4>}, {transform_indices = @transform_5, window_bounds = array<i64: 1, 16, 8>}]} {
    %c0 = arith.constant 0 : index
    %c0_0 = arith.constant 0 : index
    %0 = vector.load %arg1[%c0, %c0_0] : memref<4x128xf32, #tpu.memory_space<vmem>>, vector<4x128xf32>
    %c0_1 = arith.constant 0 : index
    %c0_2 = arith.constant 0 : index
    %1 = vector.load %arg2[%c0_1, %c0_2] : memref<4x1xf32, #tpu.memory_space<vmem>>, vector<4x1xf32>
    %2 = vector.broadcast %1 : vector<4x1xf32> to vector<4x128xf32>
    %3 = arith.mulf %0, %2 : vector<4x128xf32>
    %c0_3 = arith.constant 0 : index
    %c0_4 = arith.constant 0 : index
    %4 = vector.load %arg3[%c0_3, %c0_4] : memref<4x1xf32, #tpu.memory_space<vmem>>, vector<4x1xf32>
    %5 = vector.broadcast %4 : vector<4x1xf32> to vector<4x128xf32>
    %6 = arith.addf %3, %5 : vector<4x128xf32>
    %cst = arith.constant 0.000000e+00 : f32
    %7 = vector.broadcast %cst : f32 to vector<4x128xf32>
    %8 = arith.cmpf oge, %6, %7 : vector<4x128xf32>
    %c0_5 = arith.constant 0 : index
    %9 = memref.load %arg4[%c0_5] : memref<1xf32, #tpu.memory_space<smem>>
    %10 = vector.broadcast %9 : f32 to vector<4x128xf32>
    %11 = arith.mulf %10, %6 : vector<4x128xf32>
    %12 = arith.select %8, %6, %11 : vector<4x128xi1>, vector<4x128xf32>
    %c0_6 = arith.constant 0 : index
    %c0_7 = arith.constant 0 : index
    %13 = vector.load %arg5[%c0_6, %c0_7] : memref<16x4xf32, #tpu.memory_space<vmem>>, vector<16x4xf32>
    %cst_8 = arith.constant dense<0.000000e+00> : vector<16x128xf32>
    %14 = tpu.matmul %13, %12, %cst_8 {dimension_numbers = #tpu.dot_dimension_numbers<[1], [0], [0], [1], [0, 0, 1, 1], [], []>} : vector<16x4xf32>, vector<4x128xf32>, vector<16x128xf32> -> vector<16x128xf32>
    %cst_9 = arith.constant dense<0.000000e+00> : vector<16xf32>
    %15 = vector.multi_reduction <add>, %14, %cst_9 [1] : vector<16x128xf32> to vector<16xf32>
    %16 = vector.shape_cast %15 : vector<16xf32> to vector<16x1xf32>
    %17 = arith.mulf %14, %14 : vector<16x128xf32>
    %cst_10 = arith.constant dense<0.000000e+00> : vector<16xf32>
    %18 = vector.multi_reduction <add>, %17, %cst_10 [1] : vector<16x128xf32> to vector<16xf32>
    %19 = vector.shape_cast %18 : vector<16xf32> to vector<16x1xf32>
    %cst_11 = arith.constant 0.000000e+00 : f32
    %20 = vector.broadcast %cst_11 : f32 to vector<16x6xf32>
    %21 = tpu.concatenate %16, %19, %20 in 1 : vector<16x1xf32>, vector<16x1xf32>, vector<16x6xf32> -> vector<16x8xf32>
    %c0_12 = arith.constant 0 : index
    %c0_13 = arith.constant 0 : index
    %c0_14 = arith.constant 0 : index
    %22 = vector.load %arg6[%c0_12, %c0_13, %c0_14] : memref<1x16x8xf32, #tpu.memory_space<vmem>>, vector<1x16x8xf32>
    %23 = vector.shape_cast %22 : vector<1x16x8xf32> to vector<16x8xf32>
    %24 = vector.shape_cast %21 : vector<16x8xf32> to vector<1x16x8xf32>
    tpu.vector_store %arg6[%c0_12, %c0_13, %c0_14], %24 {strides = array<i32>} : memref<1x16x8xf32, #tpu.memory_space<vmem>>, vector<1x16x8xf32>,
    return
  }
  func.func @transform_0(%arg0: i32) -> (i32, i32) {
    %c0_i32 = arith.constant 0 : i32
    %c0_i32_0 = arith.constant 0 : i32
    return %c0_i32, %arg0 : i32, i32
  }
  func.func @transform_1(%arg0: i32) -> (i32, i32) {
    %c0_i32 = arith.constant 0 : i32
    %c0_i32_0 = arith.constant 0 : i32
    %c0_i32_1 = arith.constant 0 : i32
    return %c0_i32, %c0_i32_0 : i32, i32
  }
  func.func @transform_2(%arg0: i32) -> (i32, i32) {
    %c0_i32 = arith.constant 0 : i32
    %c0_i32_0 = arith.constant 0 : i32
    %c0_i32_1 = arith.constant 0 : i32
    return %c0_i32, %c0_i32_0 : i32, i32
  }
  func.func @transform_3(%arg0: i32) -> i32 {
    %c0_i32 = arith.constant 0 : i32
    %c0_i32_0 = arith.constant 0 : i32
    return %c0_i32 : i32
  }
  func.func @transform_4(%arg0: i32) -> (i32, i32) {
    %c0_i32 = arith.constant 0 : i32
    %c0_i32_0 = arith.constant 0 : i32
    %c0_i32_1 = arith.constant 0 : i32
    return %c0_i32, %c0_i32_0 : i32, i32
  }
  func.func @transform_5(%arg0: i32) -> (i32, i32, i32) {
    %c0_i32 = arith.constant 0 : i32
    %c0_i32_0 = arith.constant 0 : i32
    %c0_i32_1 = arith.constant 0 : i32
    return %arg0, %c0_i32, %c0_i32_0 : i32, i32, i32
  }
}

module attributes {stable_mosaic.version = 11 : i64} {
  func.func @_final_kernel(%arg0: i32, %arg1: memref<4x128xf32, #tpu.memory_space<vmem>>, %arg2: memref<4x1xf32, #tpu.memory_space<vmem>>, %arg3: memref<4x1xf32, #tpu.memory_space<vmem>>, %arg4: memref<1xf32, #tpu.memory_space<smem>>, %arg5: memref<16x4xf32, #tpu.memory_space<vmem>>, %arg6: memref<16x1xf32, #tpu.memory_space<vmem>>, %arg7: memref<16x128xf32, #tpu.memory_space<vmem>>) attributes {dimension_semantics = [#tpu.dimension_semantics<parallel>], iteration_bounds = array<i64: 4>, scalar_prefetch = 0 : i64, scratch_operands = 0 : i64, tpu.core_type = #tpu.core_type<tc>, window_params = [{transform_indices = @transform_0, window_bounds = array<i64: 4, 128>}, {pipeline_mode = #tpu.pipeline_mode<synchronous>, transform_indices = @transform_1, window_bounds = array<i64: 4, 1>}, {pipeline_mode = #tpu.pipeline_mode<synchronous>, transform_indices = @transform_2, window_bounds = array<i64: 4, 1>}, {transform_indices = @transform_3, window_bounds = array<i64: 1>}, {pipeline_mode = #tpu.pipeline_mode<synchronous>, transform_indices = @transform_4, window_bounds = array<i64: 16, 4>}, {pipeline_mode = #tpu.pipeline_mode<synchronous>, transform_indices = @transform_5, window_bounds = array<i64: 16, 1>}, {transform_indices = @transform_6, window_bounds = array<i64: 16, 128>}]} {
    %c0 = arith.constant 0 : index
    %c0_0 = arith.constant 0 : index
    %0 = vector.load %arg1[%c0, %c0_0] : memref<4x128xf32, #tpu.memory_space<vmem>>, vector<4x128xf32>
    %c0_1 = arith.constant 0 : index
    %c0_2 = arith.constant 0 : index
    %1 = vector.load %arg2[%c0_1, %c0_2] : memref<4x1xf32, #tpu.memory_space<vmem>>, vector<4x1xf32>
    %2 = vector.broadcast %1 : vector<4x1xf32> to vector<4x128xf32>
    %3 = arith.mulf %0, %2 : vector<4x128xf32>
    %c0_3 = arith.constant 0 : index
    %c0_4 = arith.constant 0 : index
    %4 = vector.load %arg3[%c0_3, %c0_4] : memref<4x1xf32, #tpu.memory_space<vmem>>, vector<4x1xf32>
    %5 = vector.broadcast %4 : vector<4x1xf32> to vector<4x128xf32>
    %6 = arith.addf %3, %5 : vector<4x128xf32>
    %cst = arith.constant 0.000000e+00 : f32
    %7 = vector.broadcast %cst : f32 to vector<4x128xf32>
    %8 = arith.cmpf oge, %6, %7 : vector<4x128xf32>
    %c0_5 = arith.constant 0 : index
    %9 = memref.load %arg4[%c0_5] : memref<1xf32, #tpu.memory_space<smem>>
    %10 = vector.broadcast %9 : f32 to vector<4x128xf32>
    %11 = arith.mulf %10, %6 : vector<4x128xf32>
    %12 = arith.select %8, %6, %11 : vector<4x128xi1>, vector<4x128xf32>
    %c0_6 = arith.constant 0 : index
    %c0_7 = arith.constant 0 : index
    %13 = vector.load %arg5[%c0_6, %c0_7] : memref<16x4xf32, #tpu.memory_space<vmem>>, vector<16x4xf32>
    %cst_8 = arith.constant dense<0.000000e+00> : vector<16x128xf32>
    %14 = tpu.matmul %13, %12, %cst_8 {dimension_numbers = #tpu.dot_dimension_numbers<[1], [0], [0], [1], [0, 0, 1, 1], [], []>} : vector<16x4xf32>, vector<4x128xf32>, vector<16x128xf32> -> vector<16x128xf32>
    %c0_9 = arith.constant 0 : index
    %c0_10 = arith.constant 0 : index
    %15 = vector.load %arg6[%c0_9, %c0_10] : memref<16x1xf32, #tpu.memory_space<vmem>>, vector<16x1xf32>
    %16 = vector.broadcast %15 : vector<16x1xf32> to vector<16x128xf32>
    %17 = arith.addf %14, %16 : vector<16x128xf32>
    %c0_11 = arith.constant 0 : index
    %c0_12 = arith.constant 0 : index
    %18 = vector.load %arg7[%c0_11, %c0_12] : memref<16x128xf32, #tpu.memory_space<vmem>>, vector<16x128xf32>
    tpu.vector_store %arg7[%c0_11, %c0_12], %17 {strides = array<i32>} : memref<16x128xf32, #tpu.memory_space<vmem>>, vector<16x128xf32>,
    return
  }
  func.func @transform_0(%arg0: i32) -> (i32, i32) {
    %c0_i32 = arith.constant 0 : i32
    %c0_i32_0 = arith.constant 0 : i32
    return %c0_i32, %arg0 : i32, i32
  }
  func.func @transform_1(%arg0: i32) -> (i32, i32) {
    %c0_i32 = arith.constant 0 : i32
    %c0_i32_0 = arith.constant 0 : i32
    %c0_i32_1 = arith.constant 0 : i32
    return %c0_i32, %c0_i32_0 : i32, i32
  }
  func.func @transform_2(%arg0: i32) -> (i32, i32) {
    %c0_i32 = arith.constant 0 : i32
    %c0_i32_0 = arith.constant 0 : i32
    %c0_i32_1 = arith.constant 0 : i32
    return %c0_i32, %c0_i32_0 : i32, i32
  }
  func.func @transform_3(%arg0: i32) -> i32 {
    %c0_i32 = arith.constant 0 : i32
    %c0_i32_0 = arith.constant 0 : i32
    return %c0_i32 : i32
  }
  func.func @transform_4(%arg0: i32) -> (i32, i32) {
    %c0_i32 = arith.constant 0 : i32
    %c0_i32_0 = arith.constant 0 : i32
    %c0_i32_1 = arith.constant 0 : i32
    return %c0_i32, %c0_i32_0 : i32, i32
  }
  func.func @transform_5(%arg0: i32) -> (i32, i32) {
    %c0_i32 = arith.constant 0 : i32
    %c0_i32_0 = arith.constant 0 : i32
    %c0_i32_1 = arith.constant 0 : i32
    return %c0_i32, %c0_i32_0 : i32, i32
  }
  func.func @transform_6(%arg0: i32) -> (i32, i32) {
    %c0_i32 = arith.constant 0 : i32
    %c0_i32_0 = arith.constant 0 : i32
    return %c0_i32, %arg0 : i32, i32
  }
}

</mosaic_0001>

<bundles_post_ra>
// kernel: enet_decoder_main_path.4
= control target key start
LH: loop header
LB: loop body
LE: loop exit
PB: predicated region body
PF: predicated region fallthrough
CT: control target
= control target key end

     0   :  { %s410_s12 = smov 0   ;;  %s433_s0 = inlined_call_operand.vmem [shape: f32[8,512], index: 0, kind: input, shape index: {}]   ;;  %s434_s1 = inlined_call_operand.vmem [shape: f32[4,8], index: 1, kind: input, shape index: {}]   ;;  %s435_s2 = inlined_call_operand.vmem [shape: f32[4,512], index: 2, kind: output, shape index: {0}]   ;;  %s436_s3 = inlined_call_operand.vmem [shape: f32[4,4,8], index: 3, kind: output, shape index: {1}]  }
   0x1 LB: > { %s352_s13 = sadd.s32 4294967295, %s386_s12   ;;  %p356_p0 = scmp.ge.s32.totalorder %s386_s12, 1  ;;  %s386_s12 = sphi %s410_s12, %s14_s12  }
   0x2   : > { %p139_p1 = scmp.lt.s32.totalorder %s386_s12, 5 }
   0x4   : > { %p140_p2 = pnand %p356_p0, %p139_p1 }
   0x5   : > { %p165_p3 = scmp.lt.s32.totalorder (!%p140_p2), %s352_s13, 3 }
   0x6   : > { %143 = sbr.rel (%p140_p2) target bundleno = 355 (0x163), region = 28 }
   0xb   : > { %v388_v0 = vmov 0.0   ;;  %vm389_vm0 = vmmov 0   ;;  %s438_s13 = smov (!%p165_p3, %s352_s13), 3  ;;  %v177_v1 = vld [vmem:[%s434_s1] sm:$0xf]  ;;  %vm179_vm1 = vcmask 64512  }
   0xc   : > { %365 = vmatprep.subr.mxu0 %v388_v0  ;;  %367 = vmatprep.mubr.msk.f32.mxu0 %vm389_vm0, %v388_v0  ;;  %s357_s14 = sshll.u32 %s438_s13, 3  ;;  %s358_s20 = sshll.u32 %s438_s13, 2  ;;  %vm254_vm2 = vcmask 1043456   ;;  %vm262_vm3 = vcmask 7168   ;;  %vm264_vm4 = vcmask 15360   ;;  %vm266_vm5 = vcmask 60416  }
   0xd   : > { %s168_s17 = scalar_lea.vmem %s433_s0, %s357_s14  ;;  %s172_s23 = scalar_lea.vmem %s435_s2, %s358_s20 }
   0xe   : > { %v178_v2 = vld [vmem:[%s168_s17] sm:$0xff]  ;;  %s176_s26 = scalar_lea.vmem %s436_s3, %s358_s20 }
   0xf   : > { %366 = vmatpush3.msra.mxu0 %v178_v2 }
  0x10   : > { %368 = vmatmul.mubr.msk.f32.vlgmr.msra.gmra.mxu0 %vm179_vm1, %v177_v1 }
  0xd0   : > { %v249_v3 = vpop.f32.mrf.mxu0 }
  0xd1   : > { %253 = vst [vmem:[%s172_s23] sm:$0xf] %v249_v3  ;;  %v255_v4 = vsel %vm254_vm2, %v249_v3, 0.0  ;;  %v258_v5 = vmul.f32 %v249_v3, %v249_v3 }
  0xd2   : > { %256 = vadd.xlane.f32.xlu0 %v255_v4  ;;  %v369_v6 = vpop.f32.mrf.mxu0 }
  0xd3   : > { %v259_v7 = vsel %vm254_vm2, %v258_v5, 0.0 }
  0xd6   : > { %260 = vadd.xlane.f32.xlu0 %v259_v7 }
 0x15b   : > { %v257_v8 = vpop.xlane.xlu0 %256 }
 0x15f   : > { %v261_v9 = vpop.xlane.xlu0 %260 }
 0x160   : > { %v263_v10 = vsel %vm262_vm3, %v257_v8, %v261_v9 }
 0x161   : > { %v265_v11 = vsel %vm264_vm4, %v263_v10, 0.0 }
 0x162   : > { %267 = vst.msk [vmem:[%s176_s26] sm:$0xf] %vm266_vm5, %v265_v11 }
 0x163 PF: > { %s14_s12 = sadd.s32 1, %s386_s12  }
 0x164   : > { %p11_p4 = scmp.ge.s32.totalorder %s14_s12, 6  }
 0x166   :  { %13 = sbr.rel (!%p11_p4) target bundleno = 1 (0x1), region = 70 }

// kernel: enet_decoder_main_path.6
= control target key start
LH: loop header
LB: loop body
LE: loop exit
PB: predicated region body
PF: predicated region fallthrough
CT: control target
= control target key end

     0   :  { %s479_s20 = smov 0   ;;  %s514_s0 = inlined_call_operand.vmem [shape: f32[4,512], index: 0, kind: input, shape index: {}]   ;;  %s515_s1 = inlined_call_operand.vmem [shape: f32[4,1], index: 1, kind: input, shape index: {}]   ;;  %s516_s2 = inlined_call_operand.vmem [shape: f32[4,1], index: 2, kind: input, shape index: {}]   ;;  %s517_s3 = inlined_call_operand.<no memory space> [shape: f32[1], index: 3, kind: input, shape index: {}]   ;;  %s518_s4 = inlined_call_operand.vmem [shape: f32[16,4], index: 4, kind: input, shape index: {}]   ;;  %s519_s5 = inlined_call_operand.vmem [shape: f32[4,16,8], index: 5, kind: output, shape index: {}]  }
   0x1   :  { %10 = sst [smem:[#allocation2]] %s517_s3 }
   0x2 LB: > { %s405_s21 = sadd.s32 4294967295, %s443_s20   ;;  %p409_p0 = scmp.ge.s32.totalorder %s443_s20, 1  ;;  %s443_s20 = sphi %s479_s20, %s16_s20  }
   0x3   : > { %p187_p1 = scmp.lt.s32.totalorder %s443_s20, 5 }
   0x5   : > { %p188_p2 = pnand %p409_p0, %p187_p1 }
   0x6   : > { %p214_p3 = scmp.lt.s32.totalorder (!%p188_p2), %s405_s21, 3  ;;  %s239_s28 = sld [smem:[#allocation2]] (!%p188_p2) }
   0x7   : > { %191 = sbr.rel (%p188_p2) target bundleno = 491 (0x1eb), region = 40 }
   0xc   : > { %v224_v0 = vld [vmem:[%s515_s1] sm:$0xf]  ;;  %v445_v1 = vmov 0   ;;  %vm245_vm0 = vcmask 31744   ;;  %s521_s21 = smov (!%p214_p3, %s405_s21), 3  ;;  %v240_v8 = vstv %s239_s28  ;;  %vm252_vm2 = vcmask 1043456  }
   0xd   : > { %436 = vset.pattern.permute.xlu0 %v445_v1  ;;  %v231_v2 = vld [vmem:[%s516_s2] sm:$0xf]  ;;  %s410_s27 = sshll.u32 %s521_s21, 2  ;;  %v244_v12 = vld [vmem:[%s518_s4 + $0x8] sm:$0xff]  ;;  %s418_s9 = sshll.u32 %s521_s21, 4  ;;  %vm341_vm3 = vcmask 7168  }
   0xe   : > { %227 = vperm.xlu0 %436, %v224_v0   ;;  %v243_v3 = vld [vmem:[%s518_s4] sm:$0xff]  ;;  %s217_s6 = scalar_lea.vmem %s514_s0, %s410_s27  ;;  %vm344_vm4 = vcmask 15360   ;;  %s222_s12 = scalar_lea.vmem %s519_s5, %s418_s9  ;;  %vm347_vm5 = vcmask 64512  }
   0xf   : > { %424 = vmatprep.mubr.msk.f32.mxu0 %vm245_vm0, %v243_v3  ;;  %v223_v5 = vld [vmem:[%s217_s6] sm:$0xf] }
  0x12   : > { %234 = vperm.xlu0 %436, %v231_v2  }
  0x89   : > { %v228_v4 = vpop.permute.xlu0 %227 }
  0x8a   : > { %v230_v6 = vmul.f32 %v228_v4, %v223_v5 }
  0x8d   : > { %v235_v7 = vpop.permute.xlu0 %234 }
  0x8e   : > { %v237_v9 = vadd.f32 %v235_v7, %v230_v6 }
  0x90   : > { %vm238_vm1 = vcmp.ge.f32.partialorder %v237_v9, 0.0  ;;  %v241_v10 = vmul.f32 %v240_v8, %v237_v9 }
  0x92   : > { %v242_v11 = vsel %vm238_vm1, %v237_v9, %v241_v10 }
  0x93   : > { %422 = vmatprep.subr.msk.mxu0 %vm252_vm2, %v242_v11 }
  0x94   : > { %423 = vmatpush3.msk.msra.mxu0 %vm252_vm2, %v242_v11 }
  0x95   : > { %425 = vmatmul.mubr.msk.f32.vlgmr.msra.gmra.mxu0 %vm245_vm0, %v244_v12 }
 0x155   : > { %v426_v13 = vpop.f32.mrf.mxu0 }
 0x156   : > { %333 = vadd.xlane.f32.xlu1 %v426_v13  ;;  %v336_v16 = vmul.f32 %v426_v13, %v426_v13 }
 0x157   : > { %v322_v14 = vpop.f32.mrf.mxu0 }
 0x158   : > { %v335_v15 = vmul.f32 %v322_v14, %v322_v14 }
 0x15a   : > { %331 = vadd.xlane.f32.xlu1 %v322_v14  ;;  %337 = vadd.xlane.f32.xlu0 %v335_v15 }
 0x15e   : > { %339 = vadd.xlane.f32.xlu1 %v336_v16 }
 0x1df   : > { %v334_v17 = vpop.xlane.xlu1 %333 }
 0x1e3   : > { %v332_v18 = vpop.xlane.xlu1 %331  ;;  %v338_v19 = vpop.xlane.xlu0 %337 }
 0x1e4   : > { %v342_v20 = vsel %vm341_vm3, %v332_v18, %v338_v19 }
 0x1e5   : > { %v345_v21 = vsel %vm344_vm4, %v342_v20, 0.0 }
 0x1e6   : > { %348 = vst.msk [vmem:[%s222_s12] sm:$0xff] %vm347_vm5, %v345_v21 }
 0x1e7   : > { %v340_v22 = vpop.xlane.xlu1 %339 }
 0x1e8   : > { %v343_v23 = vsel %vm341_vm3, %v334_v17, %v340_v22 }
 0x1e9   : > { %v346_v24 = vsel %vm344_vm4, %v343_v23, 0.0 }
 0x1ea   : > { %349 = vst.msk [vmem:[%s222_s12 + $0x8] sm:$0xff] %vm347_vm5, %v346_v24 }
 0x1eb PF: > { %s16_s20 = sadd.s32 1, %s443_s20  }
 0x1ec   : > { %p13_p4 = scmp.ge.s32.totalorder %s16_s20, 6  }
 0x1ee   :  { %15 = sbr.rel (!%p13_p4) target bundleno = 2 (0x2), region = 70 }

// kernel: enet_decoder_main_path.7
= control target key start
LH: loop header
LB: loop body
LE: loop exit
PB: predicated region body
PF: predicated region fallthrough
CT: control target
= control target key end

     0   :  { %s645_s0 = inlined_call_operand.vmem [shape: f32[4,512], index: 0, kind: input, shape index: {}]   ;;  %s646_s1 = inlined_call_operand.vmem [shape: f32[4,1], index: 1, kind: input, shape index: {}]   ;;  %s647_s2 = inlined_call_operand.vmem [shape: f32[4,1], index: 2, kind: input, shape index: {}]   ;;  %s648_s3 = inlined_call_operand.<no memory space> [shape: f32[1], index: 3, kind: input, shape index: {}]   ;;  %s649_s4 = inlined_call_operand.vmem [shape: f32[16,4], index: 4, kind: input, shape index: {}]   ;;  %s650_s5 = inlined_call_operand.vmem [shape: f32[16,1], index: 5, kind: input, shape index: {}]   ;;  %s651_s6 = inlined_call_operand.vmem [shape: f32[16,512], index: 6, kind: output, shape index: {}]  }
   0x1   :  { %11 = sst [smem:[#allocation2]] %s648_s3 }
   0x2   :  { %s574_s23 = smov 0   ;;  %s576_s24 = smov 0  }
   0x3   :  { %s578_s25 = smov 0  }
   0x4 LB: > { %s587_s3 = sadd.s32 4294967295, %s533_s25   ;;  %s589_s26 = sadd.s32 1, %s533_s25   ;;  %s533_s25 = sphi %s578_s25, %s655_s25   ;;  %s529_s24 = sphi %s576_s24, %s654_s24   ;;  %s525_s23 = sphi %s574_s23, %s653_s23  }
   0x5   : > { %s152_s27 = ssub.s32 %s533_s25, %s589_s26  ;;  %s155_s28 = sadd.s32 1, %s529_s24 }
   0x6   : > { %p153_p0 = scmp.eq.s32.totalorder %s152_s27, 0  ;;  %p165_p1 = scmp.ne.s32.totalorder %s529_s24, %s525_s23 }
   0x7   : > { %p166_p2 = scmp.eq.s32.totalorder %s587_s3, 3  ;;  %p466_p3 = scmp.ge.s32.totalorder %s533_s25, 1 }
   0x8   : > { %s597_s29 = scalar_select %p153_p0, %s529_s24, %s155_s28  }
   0x9   : > { %p599_p4 = por %p166_p2, %p165_p1  ;;  %p212_p5 = scmp.lt.s32.totalorder %s533_s25, 5 }
   0xb   : > { %p213_p6 = pnand %p466_p3, %p212_p5 }
   0xc   : > { %p240_p7 = scmp.lt.s32.totalorder (!%p213_p6), %s587_s3, 3  ;;  %s260_s19 = sld [smem:[#allocation2]] (!%p213_p6) }
   0xd   : > { %216 = sbr.rel (%p213_p6) target bundleno = 361 (0x169), region = 44  ;;  %s237_s28 = sand.u32 (!%p213_p6), 1, %s525_s23  }
   0xe   : > { %s467_s7 = sshll.u32 (!%p213_p6), %s237_s28, 4 }
   0xf   : > { %s239_s8 = scalar_lea.vmem (!%p213_p6), [#allocation3], %s467_s7 }
  0x12   : > { %v245_v0 = vld [vmem:[%s646_s1] sm:$0xf]  ;;  %v535_v1 = vmov 0   ;;  %vm278_vm0 = vcmask 31744   ;;  %v267_v5 = vld [vmem:[%s650_s5 + $0x8] sm:$0xff]  ;;  %s241_s17 = scalar_select %p240_p7, %s587_s3, 3  ;;  %v261_v10 = vstv %s260_s19 }
  0x13   : > { %509 = vset.pattern.permute.xlu0 %v535_v1  ;;  %510 = vset.pattern.permute.xlu1 %v535_v1  ;;  %v252_v2 = vld [vmem:[%s647_s2] sm:$0xf]  ;;  %vm285_vm2 = vcmask 1043456   ;;  %v265_v14 = vld [vmem:[%s649_s4 + $0x8] sm:$0xff]  ;;  %s473_s9 = sshll.u32 (%p599_p4), %s587_s3, 3 }
  0x14   : > { %248 = vperm.xlu0 %509, %v245_v0   ;;  %v264_v3 = vld [vmem:[%s649_s4] sm:$0xff]  ;;  %s468_s18 = sshll.u32 %s241_s17, 2  ;;  %s374_s23 = scalar_lea.vmem (%p599_p4), %s651_s6, %s473_s9 }
  0x15   : > { %481 = vmatprep.mubr.msk.f32.mxu0 %vm278_vm0, %v264_v3  ;;  %v266_v4 = vld [vmem:[%s650_s5] sm:$0xff]  ;;  %s243_s22 = scalar_lea.vmem %s645_s0, %s468_s18 }
  0x16   : > { %270 = vperm.xlu1 %510, %v266_v4   ;;  %v244_v7 = vld [vmem:[%s243_s22] sm:$0xf] }
  0x18   : > { %255 = vperm.xlu0 %509, %v252_v2  }
  0x1a   : > { %275 = vperm.xlu1 %510, %v267_v5  }
  0x8f   : > { %v249_v6 = vpop.permute.xlu0 %248 }
  0x90   : > { %v251_v8 = vmul.f32 %v249_v6, %v244_v7 }
  0x91   : > { %v271_v15 = vpop.permute.xlu1 %270 }
  0x93   : > { %v256_v9 = vpop.permute.xlu0 %255 }
  0x94   : > { %v258_v11 = vadd.f32 %v256_v9, %v251_v8 }
  0x95   : > { %v276_v16 = vpop.permute.xlu1 %275 }
  0x96   : > { %vm259_vm1 = vcmp.ge.f32.partialorder %v258_v11, 0.0  ;;  %v262_v12 = vmul.f32 %v261_v10, %v258_v11 }
  0x98   : > { %v263_v13 = vsel %vm259_vm1, %v258_v11, %v262_v12 }
  0x99   : > { %479 = vmatprep.subr.msk.mxu0 %vm285_vm2, %v263_v13 }
  0x9a   : > { %480 = vmatpush3.msk.msra.mxu0 %vm285_vm2, %v263_v13 }
  0x9b   : > { %482 = vmatmul.mubr.msk.f32.vlgmr.msra.gmra.mxu0 %vm278_vm0, %v265_v14 }
 0x15b   : > { %v483_v17 = vpop.f32.mrf.mxu0 }
 0x15c   : > { %v361_v18 = vadd.f32 %v483_v17, %v276_v16  ;;  %372 = sbr.rel (!%p599_p4) target bundleno = 361 (0x169), region = 48 }
 0x15d   : > { %v355_v19 = vpop.f32.mrf.mxu0 }
 0x15e   : > { %365 = vst [vmem:[%s239_s8 + $0x8] sm:$0xff] %v361_v18  ;;  %v356_v20 = vadd.f32 %v355_v19, %v271_v15 }
 0x160   : > { %364 = vst [vmem:[%s239_s8] sm:$0xff] %v356_v20 }
 0x165   : > { %v407_v22 = vld [vmem:[%s239_s8 + $0x8] sm:$0xff] }
 0x166   : > { %408 = vst [vmem:[%s374_s23 + $0x20] sm:$0xff] %v407_v22 }
 0x167   : > { %v405_v21 = vld [vmem:[%s239_s8] sm:$0xff] }
 0x168   : > { %406 = vst [vmem:[%s374_s23] sm:$0xff] %v405_v21 }
 0x169 PF: > { %p14_p8 = scmp.ge.s32.totalorder %s589_s26, 6   ;;  %s653_s23 = smov %s529_s24 }
 0x16a   : > { %s654_s24 = smov %s597_s29  ;;  %s655_s25 = smov %s589_s26 }
 0x16b   :  { %16 = sbr.rel (!%p14_p8) target bundleno = 4 (0x4), region = 112 }

// kernel: enet_decoder_main_path.5
= control target key start
LH: loop header
LB: loop body
LE: loop exit
PB: predicated region body
PF: predicated region fallthrough
CT: control target
= control target key end

     0   :  { %s4675_s0 = inlined_call_operand.vmem [shape: f32[4,2,16,16], index: 0, kind: input, shape index: {}]   ;;  %s4676_s1 = inlined_call_operand.vmem [shape: f32[4,1,1], index: 1, kind: input, shape index: {}]   ;;  %s4677_s2 = inlined_call_operand.vmem [shape: f32[4,1,1], index: 2, kind: input, shape index: {}]   ;;  %s4678_s3 = inlined_call_operand.<no memory space> [shape: f32[1], index: 3, kind: input, shape index: {}]   ;;  %s4679_s4 = inlined_call_operand.vmem [shape: f32[4,36], index: 4, kind: input, shape index: {}]   ;;  %s4680_s5 = inlined_call_operand.vmem [shape: f32[4,1], index: 5, kind: input, shape index: {}]   ;;  %s4681_s6 = inlined_call_operand.vmem [shape: f32[4,512], index: 6, kind: output, shape index: {0}]   ;;  %s4682_s7 = inlined_call_operand.vmem [shape: f32[2,4,8], index: 7, kind: output, shape index: {1}]  }
   0x1   :  { %13 = sst [smem:[#allocation2]] %s4678_s3 }
   0x2   :  { %s3031_s26 = smov 0   ;;  %s3033_s27 = smov 0  }
   0x3   :  { %s3035_s28 = smov 0  }
   0x4 LB: > { %s3047_s3 = sadd.s32 4294967295, %s2972_s28   ;;  %s3050_s29 = sadd.s32 1, %s2972_s28   ;;  %s2972_s28 = sphi %s3035_s28, %s4768_s28   ;;  %s2968_s27 = sphi %s3033_s27, %s4767_s27   ;;  %s2964_s26 = sphi %s3031_s26, %s4766_s26  }
   0x5   : > { %s23_s30 = ssub.s32 %s2972_s28, %s3050_s29  ;;  %s26_s8 = sadd.s32 1, %s2968_s27 }
   0x6   : > { %p24_p0 = scmp.eq.s32.totalorder %s23_s30, 0  ;;  %p33_p1 = scmp.ne.s32.totalorder %s2968_s27, %s2964_s26 }
   0x7   : > { %p34_p2 = scmp.eq.s32.totalorder %s2972_s28, 0  ;;  %p2887_p4 = scmp.ge.s32.totalorder %s2972_s28, 2 }
   0x8   : > { %s3059_s9 = scalar_select %p24_p0, %s2968_s27, %s26_s8  }
   0x9   : > { %p35_p3 = por %p34_p2, %p33_p1  ;;  %231 = sbr.rel (%p2887_p4) target bundleno = 22 (0x16), region = 36 }
   0xe   : > { %234 = sbr.rel (!%p35_p3) target bundleno = 22 (0x16), region = 40  ;;  %s236_s10 = sand.u32 (%p35_p3), 1, %s2968_s27  }
   0xf   : > { %s2909_s11 = sshll.u32 (%p35_p3), %s2972_s28, 4  ;;  %s2888_s12 = sshll.u32 (%p35_p3), %s236_s10, 6 }
  0x10   : > { %s241_s15 = scalar_lea.vmem (%p35_p3), %s4675_s0, %s2909_s11  ;;  %s238_s16 = scalar_lea.vmem (%p35_p3), [#allocation3], %s2888_s12 }
  0x11   : > { %v284_v0 = vld [vmem:[%s241_s15] sm:$0xff] (%p35_p3)  ;;  %v286_v1 = vld [vmem:[%s241_s15 + $0x8] sm:$0xff] (%p35_p3) }
  0x12   : > { %v288_v2 = vld [vmem:[%s241_s15 + $0x20] sm:$0xff] (%p35_p3)  ;;  %285 = vst [vmem:[%s238_s16] sm:$0xff] (%p35_p3), %v284_v0  ;;  %287 = vst [vmem:[%s238_s16 + $0x8] sm:$0xff] (%p35_p3), %v286_v1  ;;  %v290_v3 = vld [vmem:[%s241_s15 + $0x28] sm:$0xff] (%p35_p3) }
  0x13   : > { %289 = vst [vmem:[%s238_s16 + $0x10] sm:$0xff] %v288_v2  ;;  %v292_v4 = vld [vmem:[%s241_s15 + $0x40] sm:$0xff]  ;;  %v294_v5 = vld [vmem:[%s241_s15 + $0x48] sm:$0xff]  ;;  %291 = vst [vmem:[%s238_s16 + $0x18] sm:$0xff] %v290_v3 }
  0x14   : > { %293 = vst [vmem:[%s238_s16 + $0x20] sm:$0xff] %v292_v4  ;;  %295 = vst [vmem:[%s238_s16 + $0x28] sm:$0xff] %v294_v5  ;;  %v296_v6 = vld [vmem:[%s241_s15 + $0x60] sm:$0xff]  ;;  %v298_v7 = vld [vmem:[%s241_s15 + $0x68] sm:$0xff] }
  0x15   : > { %297 = vst [vmem:[%s238_s16 + $0x30] sm:$0xff] %v296_v6  ;;  %299 = vst [vmem:[%s238_s16 + $0x38] sm:$0xff] %v298_v7 }
  0x16 PF: > { %p2891_p5 = scmp.ge.s32.totalorder %s2972_s28, 1  ;;  %p304_p6 = scmp.lt.s32.totalorder %s2972_s28, 3 }
  0x18   : > { %p305_p7 = pnand %p2891_p5, %p304_p6 }
  0x1a   : > { %308 = sbr.rel (%p305_p7) target bundleno = 1103 (0x44f), region = 78 }
  0x1f   : > { %v2898_v8 = vld [vmem:[%s4676_s1 + $0x2] ss:$0 sm:$0xff]  ;;  %v2896_v9 = vld [vmem:[%s4676_s1] ss:$0 sm:$0xff]  ;;  %v2974_v10 = vmov 0   ;;  %s311_s14 = sand.u32 1, %s2964_s26  }
  0x20   : > { %2949 = vset.pattern.permute.xlu1 %v2974_v10  ;;  %2948 = vset.pattern.permute.xlu0 %v2974_v10  ;;  %v2899_v11 = vld [vmem:[%s4676_s1 + $0x3] ss:$0 sm:$0xff]  ;;  %v2897_v12 = vld [vmem:[%s4676_s1 + $0x1] ss:$0 sm:$0xff]  ;;  %v2900_v14 = vld [vmem:[%s4677_s2] ss:$0 sm:$0xff] }
  0x21   : > { %397 = vperm.xlu1 %2949, %v2898_v8   ;;  %389 = vperm.xlu0 %2948, %v2896_v9   ;;  %v2901_v13 = vld [vmem:[%s4677_s2 + $0x1] ss:$0 sm:$0xff]  ;;  %v2903_v15 = vld [vmem:[%s4677_s2 + $0x3] ss:$0 sm:$0xff]  ;;  %v2902_v16 = vld [vmem:[%s4677_s2 + $0x2] ss:$0 sm:$0xff] }
  0x22   : > { %s2892_s15 = sshll.u32 %s311_s14, 6  ;;  %s468_s16 = sld [smem:[#allocation2]]  ;;  %v4687_v2 = vmov 0.0   ;;  %vm518_vm8 = vcmask 7168   ;;  %vm527_vm9 = vcmask 138240   ;;  %vm544_vm10 = vcmask 1040384  }
  0x23   : > { %s313_s17 = scalar_lea.vmem [#allocation3], %s2892_s15  ;;  %s2975_s26 = smov 1   ;;  %2762 = vmatprep.mubr.f32.mxu0 %v4687_v2  ;;  %vm1953_vm11 = vcmask 1045504   ;;  %vm1258_vm12 = vcmask 1046528   ;;  %vm769_vm13 = vcmask 130048   ;;  %vm771_vm14 = vcmask 261120  }
  0x24   : > { %v356_v19 = vld [vmem:[%s313_s17] sm:$0xff]  ;;  %v357_v20 = vld [vmem:[%s313_s17 + $0x8] sm:$0xff]  ;;  %v358_v23 = vld [vmem:[%s313_s17 + $0x10] sm:$0xff]  ;;  %s2977_s18 = smov 127   ;;  %s2979_s19 = smov 126   ;;  %vm773_vm15 = vcmask 392192  }
  0x25   : > { %401 = vperm.xlu1 %2949, %v2899_v11   ;;  %393 = vperm.xlu0 %2948, %v2897_v12   ;;  %v359_v24 = vld [vmem:[%s313_s17 + $0x18] sm:$0xff]  ;;  %v360_v32 = vld [vmem:[%s313_s17 + $0x20] sm:$0xff]  ;;  %v361_v33 = vld [vmem:[%s313_s17 + $0x28] sm:$0xff]  ;;  %s2981_s20 = smov 32   ;;  %s2982_s21 = smov 64  }
  0x26   : > { %v362_v42 = vld [vmem:[%s313_s17 + $0x30] sm:$0xff]  ;;  %v363_v43 = vld [vmem:[%s313_s17 + $0x38] sm:$0xff]  ;;  %s2983_s22 = smov 96   ;;  %s2984_s23 = smov 48  }
  0x27   : > { %s2985_s24 = smov 16   ;;  %s2986_s25 = smov 80  }
  0x28   : > { %v469_v31 = vstv %s468_s16  ;;  %s2987_s28 = smov 112   ;;  %s2893_s12 = sshll.u32 %s3047_s3, 1 }
  0x29   : > { %441 = vperm.xlu1 %2949, %v2901_v13   ;;  %437 = vperm.xlu0 %2948, %v2900_v14   ;;  %p347_p8 = scmp.lt.s32.totalorder %s2893_s12, 3  ;;  %p352_p9 = scmp.lt.s32.totalorder %s3047_s3, 1 }
  0x2b   : > { %s4770_s12 = smov (!%p347_p8, %s2893_s12), 3  ;;  %s4772_s3 = smov (!%p352_p9, %s3047_s3), 1 }
  0x2c   : > { %s2894_s13 = sshll.u32 %s4770_s12, 2  ;;  %s2895_s17 = sshll.u32 %s4772_s3, 2 }
  0x2d   : > { %449 = vperm.xlu1 %2949, %v2903_v15   ;;  %445 = vperm.xlu0 %2948, %v2902_v16   ;;  %s350_s16 = scalar_lea.vmem %s4681_s6, %s2894_s13 }
  0x9c   : > { %v398_v17 = vpop.permute.xlu1 %397  ;;  %v390_v18 = vpop.permute.xlu0 %389 }
  0x9d   : > { %v404_v25 = vmul.f32 %v390_v18, %v356_v19  ;;  %v405_v26 = vmul.f32 %v390_v18, %v357_v20  ;;  %v408_v40 = vmul.f32 %v398_v17, %v360_v32  ;;  %v409_v41 = vmul.f32 %v398_v17, %v361_v33 }
  0x9e   : > { %v2978_v19 = vmov 1983009808  }
  0x9f   : > { %v3108_v20 = vunpack.c.l.s4 %v2978_v19 }
  0xa0   : > { %v402_v21 = vpop.permute.xlu1 %401  ;;  %v394_v22 = vpop.permute.xlu0 %393 }
  0xa1   : > { %v406_v27 = vmul.f32 %v394_v22, %v358_v23  ;;  %v407_v28 = vmul.f32 %v394_v22, %v359_v24  ;;  %v410_v52 = vmul.f32 %v402_v21, %v362_v42  ;;  %v411_v53 = vmul.f32 %v402_v21, %v363_v43 }
  0xa2   : > { %v581_v33 = vunpack.c.0.s8 %v3108_v20 }
  0xa4   : > { %v442_v29 = vpop.permute.xlu1 %441  ;;  %v438_v30 = vpop.permute.xlu0 %437 }
  0xa5   : > { %v454_v34 = vadd.f32 %v442_v29, %v406_v27  ;;  %v455_v35 = vadd.f32 %v442_v29, %v407_v28  ;;  %v452_v36 = vadd.f32 %v438_v30, %v404_v25  ;;  %v453_v37 = vadd.f32 %v438_v30, %v405_v26 }
  0xa6   : > { %v582_v29 = vlaneseq }
  0xa7   : > { %vm461_vm0 = vcmp.ge.f32.partialorder %v453_v37, 0.0  ;;  %v471_v38 = vmul.f32 %v469_v31, %v453_v37  ;;  %vm460_vm1 = vcmp.ge.f32.partialorder %v452_v36, 0.0  ;;  %v470_v39 = vmul.f32 %v469_v31, %v452_v36 }
  0xa8   : > { %v446_v44 = vpop.permute.xlu0 %445  ;;  %v473_v45 = vmul.f32 %v469_v31, %v455_v35  ;;  %v472_v46 = vmul.f32 %v469_v31, %v454_v34  ;;  %v450_v47 = vpop.permute.xlu1 %449  ;;  %vm463_vm2 = vcmp.ge.f32.partialorder %v455_v35, 0.0  ;;  %vm462_vm3 = vcmp.ge.f32.partialorder %v454_v34, 0.0 }
  0xa9   : > { %v456_v48 = vadd.f32 %v446_v44, %v408_v40  ;;  %v457_v49 = vadd.f32 %v446_v44, %v409_v41  ;;  %v479_v50 = vsel %vm461_vm0, %v453_v37, %v471_v38  ;;  %v478_v51 = vsel %vm460_vm1, %v452_v36, %v470_v39 }
  0xaa   : > { %496 = vrot.lane.b32.xlu1 %v479_v50, %s2975_s26  ;;  %494 = vrot.lane.b32.xlu0 %v478_v51, %s2975_s26  ;;  %v458_v54 = vadd.f32 %v450_v47, %v410_v52  ;;  %v459_v55 = vadd.f32 %v450_v47, %v411_v53  ;;  %v481_v56 = vsel %vm463_vm2, %v455_v35, %v473_v45  ;;  %v3151_v51 = vshrl.u32 %v582_v29, 7 }
  0xab   : > { %v480_v57 = vsel %vm462_vm3, %v454_v34, %v472_v46  ;;  %v475_v58 = vmul.f32 %v469_v31, %v457_v49  ;;  %v474_v59 = vmul.f32 %v469_v31, %v456_v48  ;;  %vm465_vm4 = vcmp.ge.f32.partialorder %v457_v49, 0.0 }
  0xac   : > { %vm464_vm5 = vcmp.ge.f32.partialorder %v456_v48, 0.0  ;;  %v477_v62 = vmul.f32 %v469_v31, %v459_v55  ;;  %v476_v63 = vmul.f32 %v469_v31, %v458_v54  ;;  %vm467_vm6 = vcmp.ge.f32.partialorder %v459_v55, 0.0 }
  0xad   : > { %v483_v60 = vsel %vm465_vm4, %v457_v49, %v475_v58  ;;  %v482_v61 = vsel %vm464_vm5, %v456_v48, %v474_v59  ;;  %vm466_vm7 = vcmp.ge.f32.partialorder %v458_v54, 0.0  ;;  %vm775_vm0 = vcmask 523264  }
  0xae   : > { %500 = vrot.lane.b32.xlu1 %v481_v56, %s2975_s26  ;;  %498 = vrot.lane.b32.xlu0 %v480_v57, %s2975_s26  ;;  %v485_v0 = vsel %vm467_vm6, %v459_v55, %v477_v62  ;;  %v484_v1 = vsel %vm466_vm7, %v458_v54, %v476_v63  ;;  %vm777_vm1 = vcmask 654336   ;;  %vm779_vm2 = vcmask 785408  }
  0xaf   : > { %vm781_vm3 = vcmask 916480   ;;  %vm2672_vm4 = vcmask 1043456   ;;  %vm2688_vm5 = vcmask 293888   ;;  %vm2787_vm6 = vcmask 15360  }
  0xb0   : > { %vm2789_vm7 = vcmask 60416  }
  0xb2   : > { %504 = vrot.lane.b32.xlu1 %v483_v60, %s2975_s26  ;;  %502 = vrot.lane.b32.xlu0 %v482_v61, %s2975_s26 }
  0xb6   : > { %508 = vrot.lane.b32.xlu1 %v485_v0, %s2975_s26  ;;  %506 = vrot.lane.b32.xlu0 %v484_v1, %s2975_s26 }
 0x11c   : > { %v497_v3 = vpop.permute.xlu1 %496  ;;  %v495_v4 = vpop.permute.xlu0 %494 }
 0x11d   : > { %v520_v5 = vsel %vm518_vm8, 0.0, %v497_v3  ;;  %v519_v6 = vsel %vm518_vm8, 0.0, %v495_v4 }
 0x11e   : > { %v529_v7 = vsel %vm527_vm9, %v520_v5, 0.0  ;;  %v528_v8 = vsel %vm527_vm9, %v519_v6, 0.0 }
 0x11f   : > { %v546_v9 = vrot.slane %v529_v7, 7  ;;  %v545_v10 = vrot.slane %v528_v8, 7 }
 0x120   : > { %v501_v11 = vpop.permute.xlu1 %500  ;;  %v499_v12 = vpop.permute.xlu0 %498 }
 0x121   : > { %v3100_v13 = vsel %vm544_vm10, %v545_v10, %v546_v9  ;;  %v522_v14 = vsel %vm518_vm8, 0.0, %v501_v11  ;;  %v521_v16 = vsel %vm518_vm8, 0.0, %v499_v12  ;;  %v3111_v21 = vsel %vm544_vm10, %v546_v9, 0.0 }
 0x122   : > { %v531_v15 = vsel %vm527_vm9, %v522_v14, 0.0  ;;  %796 = vrot.lane.b32.xlu0 %v3100_v13, %s2977_s18  ;;  %v530_v18 = vsel %vm527_vm9, %v521_v16, 0.0  ;;  %v3114_v25 = vsel %vm544_vm10, 0.0, %v545_v10  ;;  %v1957_v30 = vrot.slane %v3111_v21, 2 }
 0x123   : > { %v549_v17 = vrot.slane %v531_v15, 7  ;;  %v548_v22 = vrot.slane %v530_v18, 7  ;;  %v1955_v38 = vrot.slane %v3100_v13, 2  ;;  %v1954_v39 = vrot.slane %v3114_v25, 2 }
 0x124   : > { %v505_v23 = vpop.permute.xlu1 %504  ;;  %v503_v24 = vpop.permute.xlu0 %502 }
 0x125   : > { %v524_v26 = vsel %vm518_vm8, 0.0, %v505_v23  ;;  %v523_v27 = vsel %vm518_vm8, 0.0, %v503_v24  ;;  %v3119_v28 = vsel %vm544_vm10, %v548_v22, %v549_v17  ;;  %v3130_v40 = vsel %vm544_vm10, %v549_v17, 0.0 }
 0x126   : > { %v533_v31 = vsel %vm527_vm9, %v524_v26, 0.0  ;;  %v532_v32 = vsel %vm527_vm9, %v523_v27, 0.0  ;;  %800 = vrot.lane.b32.xlu1 %v3119_v28, %s2977_s18  ;;  %v3133_v41 = vsel %vm544_vm10, 0.0, %v548_v22  ;;  %v3154_v53 = vsel %vm1953_vm11, %v1955_v38, %v1957_v30 }
 0x127   : > { %v552_v34 = vrot.slane %v533_v31, 7  ;;  %v551_v35 = vrot.slane %v532_v32, 7  ;;  %v1962_v56 = vrot.slane %v3130_v40, 2  ;;  %v1960_v58 = vrot.slane %v3119_v28, 2 }
 0x128   : > { %v509_v36 = vpop.permute.xlu1 %508  ;;  %v507_v37 = vpop.permute.xlu0 %506  ;;  %v1959_v59 = vrot.slane %v3133_v41, 2  ;;  %v3172_v63 = vsel %vm1953_vm11, %v1954_v39, %v1955_v38  ;;  %v3217_v17 = vsub.s32 %v581_v33, %v3151_v51 }
 0x129   : > { %v526_v42 = vsel %vm518_vm8, 0.0, %v509_v36  ;;  %v525_v43 = vsel %vm518_vm8, 0.0, %v507_v37  ;;  %v3138_v44 = vsel %vm544_vm10, %v552_v34, 0.0  ;;  %v3141_v45 = vsel %vm544_vm10, %v551_v35, %v552_v34 }
 0x12a   : > { %v3144_v46 = vsel %vm544_vm10, 0.0, %v551_v35  ;;  %v535_v47 = vsel %vm527_vm9, %v526_v42, 0.0  ;;  %v1967_v48 = vrot.slane %v3138_v44, 2  ;;  %v534_v50 = vsel %vm527_vm9, %v525_v43, 0.0  ;;  %804 = vrot.lane.b32.xlu0 %v3141_v45, %s2977_s18 }
 0x12b   : > { %v555_v49 = vrot.slane %v535_v47, 7  ;;  %v554_v52 = vrot.slane %v534_v50, 7  ;;  %v1965_v54 = vrot.slane %v3141_v45, 2  ;;  %v1964_v55 = vrot.slane %v3144_v46, 2 }
 0x12c   : > { %v3195_v9 = vsel %vm1953_vm11, %v1960_v58, %v1962_v56  ;;  %v3201_v11 = vsel %vm1953_vm11, %v1959_v59, %v1960_v58  ;;  %v645_v18 = vcombine.low %v3100_v13, %v3141_v45  ;;  %v577_v20 = vcombine.low %v3114_v25, %v3144_v46 }
 0x12d   : > { %v3160_v57 = vsel %vm544_vm10, %v555_v49, 0.0  ;;  %v3166_v61 = vsel %vm544_vm10, %v554_v52, %v555_v49  ;;  %v3169_v62 = vsel %vm544_vm10, 0.0, %v554_v52  ;;  %v3179_v0 = vsel %vm1953_vm11, %v1965_v54, %v1967_v48 }
 0x12e   : > { %v1972_v60 = vrot.slane %v3160_v57, 2  ;;  %1026 = vrot.lane.b32.xlu0 %v3100_v13, %s2979_s19  ;;  %808 = vrot.lane.b32.xlu1 %v3166_v61, %s2977_s18  ;;  %v1970_v1 = vrot.slane %v3166_v61, 2  ;;  %v3183_v3 = vsel %vm1953_vm11, %v1964_v55, %v1965_v54  ;;  %v1969_v4 = vrot.slane %v3169_v62, 2 }
 0x12f   : > { %v2050_v5 = vcombine.low %v3154_v53, %v3179_v0  ;;  %v2051_v6 = vcombine.high %v3154_v53, %v3179_v0  ;;  %v1982_v7 = vcombine.low %v3172_v63, %v3183_v3  ;;  %v1983_v8 = vcombine.high %v3172_v63, %v3183_v3 }
 0x130   : > { %v3198_v10 = vsel %vm1953_vm11, %v1970_v1, %v1972_v60  ;;  %v3204_v12 = vsel %vm1953_vm11, %v1969_v4, %v1970_v1  ;;  %v661_v19 = vcombine.low %v3119_v28, %v3166_v61  ;;  %v3232_v23 = vrot.slane %v645_v18, %v3217_v17 }
 0x131   : > { %v2066_v14 = vcombine.low %v3195_v9, %v3198_v10  ;;  %v2067_v15 = vcombine.high %v3195_v9, %v3198_v10  ;;  %v1999_v16 = vcombine.high %v3201_v11, %v3204_v12  ;;  %v1998_v22 = vcombine.low %v3201_v11, %v3204_v12 }
 0x132   : > { %1034 = vrot.lane.b32.xlu0 %v3141_v45, %s2979_s19  ;;  %1030 = vrot.lane.b32.xlu1 %v3119_v28, %s2979_s19  ;;  %v3235_v24 = vrot.slane %v661_v19, %v3217_v17  ;;  %v593_v26 = vcombine.low %v3133_v41, %v3169_v62  ;;  %v646_v27 = vcombine.high %v3100_v13, %v3141_v45  ;;  %v1262_v18 = vrot.slane %v3111_v21, 1 }
 0x133   : > { %v3242_v29 = vrot.slane %v577_v20, %v3217_v17  ;;  %v662_v30 = vcombine.high %v3119_v28, %v3166_v61  ;;  %v578_v31 = vcombine.high %v3114_v25, %v3144_v46  ;;  %v594_v32 = vcombine.high %v3133_v41, %v3169_v62 }
 0x134   : > { %v678_v33 = vcombine.high %v3232_v23, %v3235_v24  ;;  %v3253_v34 = vrot.slane %v593_v26, %v3217_v17  ;;  %v3256_v35 = vrot.slane %v646_v27, %v3217_v17  ;;  %v677_v36 = vcombine.low %v3232_v23, %v3235_v24 }
 0x135   : > { %v3265_v37 = vrot.slane %v662_v30, %v3217_v17  ;;  %v3268_v38 = vrot.slane %v578_v31, %v3217_v17  ;;  %v3271_v39 = vrot.slane %v594_v32, %v3217_v17  ;;  %v3284_v50 = vrot.slane %v1998_v22, %v3217_v17 }
 0x136   : > { %794 = vrot.lane.b32.xlu0 %v3114_v25, %s2977_s18  ;;  %1038 = vrot.lane.b32.xlu1 %v3166_v61, %s2979_s19  ;;  %v610_v42 = vcombine.high %v3242_v29, %v3253_v34  ;;  %v609_v43 = vcombine.low %v3242_v29, %v3253_v34  ;;  %v3287_v52 = vrot.slane %v1982_v7, %v3217_v17  ;;  %v1260_v19 = vrot.slane %v3100_v13, 1 }
 0x137   : > { %4704 = vst [vmem:[#allocation4_spill] sm:$0xff] %v3268_v38  ;;  %4705 = vst [vmem:[#allocation5_spill] sm:$0xff] %v3271_v39  ;;  %v693_v47 = vcombine.low %v3256_v35, %v3265_v37  ;;  %v625_v48 = vcombine.low %v3268_v38, %v3271_v39  ;;  %v694_v49 = vcombine.high %v3256_v35, %v3265_v37  ;;  %v1267_v20 = vrot.slane %v3130_v40, 1 }
 0x138   : > { %v2015_v54 = vcombine.high %v3287_v52, %v3284_v50  ;;  %v3296_v55 = vrot.slane %v1983_v8, %v3217_v17  ;;  %v3299_v56 = vrot.slane %v1999_v16, %v3217_v17  ;;  %v3306_v58 = vrot.slane %v2050_v5, %v3217_v17 }
 0x139   : > { %v3309_v59 = vrot.slane %v2066_v14, %v3217_v17  ;;  %v3318_v7 = vrot.slane %v2051_v6, %v3217_v17  ;;  %v3321_v8 = vrot.slane %v2067_v15, %v3217_v17  ;;  %v2014_v14 = vcombine.low %v3287_v52, %v3284_v50 }
 0x13a   : > { %802 = vrot.lane.b32.xlu0 %v3144_v46, %s2977_s18  ;;  %798 = vrot.lane.b32.xlu1 %v3133_v41, %s2977_s18  ;;  %v2030_v60 = vcombine.low %v3296_v55, %v3299_v56  ;;  %v2031_v4 = vcombine.high %v3296_v55, %v3299_v56  ;;  %v1272_v22 = vrot.slane %v3138_v44, 1  ;;  %v1270_v26 = vrot.slane %v3141_v45, 1 }
 0x13b   : > { %v2083_v1 = vcombine.high %v3306_v58, %v3309_v59  ;;  %v2098_v5 = vcombine.low %v3318_v7, %v3321_v8  ;;  %v2099_v16 = vcombine.high %v3318_v7, %v3321_v8  ;;  %v2082_v6 = vcombine.low %v3306_v58, %v3309_v59 }
 0x13c   : > { %v1265_v21 = vrot.slane %v3119_v28, 1  ;;  %v1277_v13 = vrot.slane %v3160_v57, 1  ;;  %v1275_v44 = vrot.slane %v3166_v61, 1  ;;  %v1259_v45 = vrot.slane %v3114_v25, 1 }
 0x13d   : > { %v1269_v61 = vrot.slane %v3144_v46, 1 }
 0x13e   : > { %1024 = vrot.lane.b32.xlu0 %v3114_v25, %s2979_s19  ;;  %806 = vrot.lane.b32.xlu1 %v3169_v62, %s2977_s18  ;;  %v3375_v40 = vsel %vm1258_vm12, %v1265_v21, %v1267_v20  ;;  %v3383_v28 = vsel %vm1258_vm12, %v1275_v44, %v1277_v13  ;;  %v3395_v57 = vsel %vm1258_vm12, %v1259_v45, %v1260_v19 }
 0x13f   : > { %v3404_v25 = vsel %vm1258_vm12, %v1269_v61, %v1270_v26  ;;  %v1371_v34 = vcombine.low %v3375_v40, %v3383_v28 }
 0x140   : > { %v1287_v24 = vcombine.low %v3395_v57, %v3404_v25 }
 0x141   : > { %v1379_v45 = vrot.slane %v1371_v34, %v3217_v17 }
 0x142   : > { %1032 = vrot.lane.b32.xlu0 %v3144_v46, %s2979_s19  ;;  %1028 = vrot.lane.b32.xlu1 %v3133_v41, %s2979_s19  ;;  %v2980_v46 = vmov 1934713408   ;;  %v3491_v29 = vrot.slane %v1287_v24, %v3217_v17 }
 0x146   : > { %2190 = vrot.lane.b32.xlu0 %v3154_v53, %s2977_s18  ;;  %1036 = vrot.lane.b32.xlu1 %v3169_v62, %s2979_s19 }
 0x14a   : > { %2198 = vrot.lane.b32.xlu0 %v3179_v0, %s2977_s18  ;;  %2194 = vrot.lane.b32.xlu1 %v3195_v9, %s2977_s18 }
 0x14e   : > { %2188 = vrot.lane.b32.xlu0 %v3172_v63, %s2977_s18  ;;  %2202 = vrot.lane.b32.xlu1 %v3198_v10, %s2977_s18 }
 0x152   : > { %2196 = vrot.lane.b32.xlu0 %v3183_v3, %s2977_s18  ;;  %2192 = vrot.lane.b32.xlu1 %v3201_v11, %s2977_s18 }
 0x156   : > { %2420 = vrot.lane.b32.xlu0 %v3154_v53, %s2979_s19  ;;  %2200 = vrot.lane.b32.xlu1 %v3204_v12, %s2977_s18  ;;  %v3362_v53 = vsel %vm1258_vm12, %v1260_v19, %v1262_v18 }
 0x15a   : > { %2428 = vrot.lane.b32.xlu0 %v3179_v0, %s2979_s19  ;;  %2424 = vrot.lane.b32.xlu1 %v3195_v9, %s2979_s19  ;;  %v3372_v0 = vsel %vm1258_vm12, %v1270_v26, %v1272_v22  ;;  %v1264_v9 = vrot.slane %v3133_v41, 1  ;;  %v1288_v22 = vcombine.high %v3395_v57, %v3404_v25 }
 0x15b   : > { %v1355_v20 = vcombine.low %v3362_v53, %v3372_v0 }
 0x15d   : > { %v1363_v61 = vrot.slane %v1355_v20, %v3217_v17 }
 0x15e   : > { %1725 = vrot.lane.b32.xlu0 %v3362_v53, %s2979_s19  ;;  %2432 = vrot.lane.b32.xlu1 %v3198_v10, %s2979_s19  ;;  %v612_v10 = vunpack.c.l.s4 %v2980_v46 }
 0x162   : > { %1733 = vrot.lane.b32.xlu0 %v3372_v0, %s2979_s19  ;;  %1729 = vrot.lane.b32.xlu1 %v3375_v40, %s2979_s19 }
 0x166   : > { %2418 = vrot.lane.b32.xlu0 %v3172_v63, %s2979_s19  ;;  %1737 = vrot.lane.b32.xlu1 %v3383_v28, %s2979_s19  ;;  %v3407_v63 = vsel %vm1258_vm12, %v1264_v9, %v1265_v21  ;;  %v1372_v9 = vcombine.high %v3375_v40, %v3383_v28 }
 0x16a   : > { %2426 = vrot.lane.b32.xlu0 %v3183_v3, %s2979_s19  ;;  %2422 = vrot.lane.b32.xlu1 %v3201_v11, %s2979_s19  ;;  %v1274_v3 = vrot.slane %v3169_v62, 1  ;;  %v613_v62 = vunpack.c.0.s8 %v612_v10  ;;  %v1388_v10 = vcombine.high %v1363_v61, %v1379_v45 }
 0x16c   : > { %v1276_v41 = vsel %vm1258_vm12, %v1274_v3, %v1275_v44  ;;  %v3427_v11 = vsub.s32 %v613_v62, %v3151_v51 }
 0x16e   : > { %1723 = vrot.lane.b32.xlu0 %v3395_v57, %s2979_s19  ;;  %2430 = vrot.lane.b32.xlu1 %v3204_v12, %s2979_s19  ;;  %v692_v12 = vrot.slane %v678_v33, %v3427_v11  ;;  %v624_v51 = vrot.slane %v610_v42, %v3427_v11  ;;  %v701_v27 = vrot.slane %v693_v47, %v3427_v11 }
 0x16f   : > { %v633_v30 = vrot.slane %v625_v48, %v3427_v11  ;;  %v3457_v31 = vrot.slane %v694_v49, %v3427_v11  ;;  %v3463_v32 = vrot.slane %v677_v36, %v3427_v11  ;;  %v1303_v33 = vcombine.low %v3407_v63, %v1276_v41 }
 0x170   : > { %v710_v42 = vcombine.high %v692_v12, %v4687_v2  ;;  %v3476_v23 = vrot.slane %v609_v43, %v3427_v11  ;;  %v711_v36 = vcombine.high %v701_v27, %v4687_v2  ;;  %v1304_v43 = vcombine.high %v3407_v63, %v1276_v41 }
 0x171   : > { %4706 = vst [vmem:[#allocation6_spill] sm:$0xff] %v3457_v31  ;;  %4707 = vst [vmem:[#allocation7_spill] sm:$0xff] %v3463_v32  ;;  %v709_v35 = vcombine.high %v3463_v32, %v4687_v2  ;;  %v3486_v47 = vrot.slane %v1303_v33, %v3217_v17  ;;  %v3502_v49 = vrot.slane %v2015_v54, %v3427_v11 }
 0x172   : > { %1731 = vrot.lane.b32.xlu0 %v3404_v25, %s2979_s19  ;;  %1727 = vrot.lane.b32.xlu1 %v3407_v63, %s2979_s19  ;;  %4708 = vst [vmem:[#allocation8_spill] sm:$0xff] %v3476_v23  ;;  %v641_v37 = vcombine.high %v3476_v23, %v4687_v2  ;;  %v642_v18 = vcombine.high %v624_v51, %v4687_v2 }
 0x173   : > { %v1320_v19 = vcombine.high %v3491_v29, %v3486_v47  ;;  %v643_v13 = vcombine.high %v633_v30, %v4687_v2  ;;  %v1318_v44 = vrot.slane %v1304_v43, %v3217_v17  ;;  %v3539_v3 = vrot.slane %v2030_v60, %v3427_v11 }
 0x174   : > { %v3587_v56 = vrot.slane %v2014_v14, %v3427_v11  ;;  %v1319_v14 = vcombine.low %v3491_v29, %v3486_v47  ;;  %v3624_v47 = vrot.slane %v2082_v6, %v3427_v11  ;;  %v2047_v6 = vcombine.high %v3502_v49, %v4687_v2 }
 0x175   : > { %v3519_v21 = vrot.slane %v1320_v19, %v3427_v11 }
 0x176   : > { %1495 = vrot.lane.b32.xlu0 %v3362_v53, %s2977_s18  ;;  %1735 = vrot.lane.b32.xlu1 %v1276_v41, %s2979_s19  ;;  %v2046_v43 = vcombine.high %v3587_v56, %v4687_v2  ;;  %v3618_v19 = vrot.slane %v1319_v14, %v3427_v11  ;;  %s355_s19 = scalar_lea.vmem %s4682_s7, %s2895_s17 }
 0x17a   : > { %1503 = vrot.lane.b32.xlu0 %v3372_v0, %s2977_s18  ;;  %1499 = vrot.lane.b32.xlu1 %v3375_v40, %s2977_s18  ;;  %v1356_v40 = vcombine.high %v3362_v53, %v3372_v0 }
 0x17c   : > { %v1370_v53 = vrot.slane %v1356_v40, %v3217_v17 }
 0x17e   : > { %1493 = vrot.lane.b32.xlu0 %v3395_v57, %s2977_s18  ;;  %1507 = vrot.lane.b32.xlu1 %v3383_v28, %s2977_s18  ;;  %v1302_v57 = vrot.slane %v1288_v22, %v3217_v17  ;;  %v1351_v22 = vcombine.high %v3618_v19, %v4687_v2 }
 0x180   : > { %v1335_v46 = vcombine.low %v1302_v57, %v1318_v44  ;;  %v1336_v52 = vcombine.high %v1302_v57, %v1318_v44 }
 0x182   : > { %1501 = vrot.lane.b32.xlu0 %v3404_v25, %s2977_s18  ;;  %1497 = vrot.lane.b32.xlu1 %v3407_v63, %s2977_s18  ;;  %v3555_v60 = vrot.slane %v1335_v46, %v3427_v11 }
 0x186   : > { %1505 = vrot.lane.b32.xlu1 %v1276_v41, %s2977_s18  ;;  %746 = vrot.lane.b32.xlu0 %v692_v12, %s2981_s20  ;;  %v2097_v41 = vrot.slane %v2083_v1, %v3427_v11  ;;  %v1402_v12 = vrot.slane %v1388_v10, %v3427_v11  ;;  %v1386_v1 = vrot.slane %v1372_v9, %v3217_v17 }
 0x187   : > { %v2048_v10 = vcombine.high %v3539_v3, %v4687_v2 }
 0x188   : > { %v1404_v33 = vcombine.high %v1370_v53, %v1386_v1  ;;  %v2115_v44 = vcombine.high %v2097_v41, %v4687_v2  ;;  %v1420_v9 = vcombine.high %v1402_v12, %v4687_v2 }
 0x18a   : > { %718 = vrot.lane.b32.xlu1 %v624_v51, %s2981_s20  ;;  %754 = vrot.lane.b32.xlu0 %v701_v27, %s2982_s21  ;;  %v2045_v27 = vrot.slane %v2031_v4, %v3427_v11  ;;  %v1387_v4 = vcombine.low %v1363_v61, %v1379_v45  ;;  %v1352_v61 = vcombine.high %v3519_v21, %v4687_v2 }
 0x18c   : > { %v3602_v50 = vrot.slane %v1387_v4, %v3427_v11 }
 0x18e   : > { %726 = vrot.lane.b32.xlu1 %v633_v30, %s2982_s21  ;;  %762 = vrot.lane.b32.xlu0 %v3457_v31, %s2983_s22  ;;  %v2106_v30 = vrot.slane %v2098_v5, %v3427_v11  ;;  %v2113_v5 = vrot.slane %v2099_v16, %v3427_v11  ;;  %v1419_v16 = vcombine.high %v3602_v50, %v4687_v2 }
 0x190   : > { %v2116_v40 = vcombine.high %v2106_v30, %v4687_v2  ;;  %v2117_v14 = vcombine.high %v2113_v5, %v4687_v2 }
 0x192   : > { %750 = vrot.lane.b32.xlu0 %v710_v42, %s2984_s23  ;;  %742 = vrot.lane.b32.xlu1 %v709_v35, %s2985_s24  ;;  %v1403_v42 = vcombine.low %v1370_v53, %v1386_v1 }
 0x194   : > { %v3496_v48 = vpop.permute.xlu0 %796  ;;  %v1411_v55 = vrot.slane %v1403_v42, %v3427_v11 }
 0x196   : > { %758 = vrot.lane.b32.xlu0 %v711_v36, %s2986_s25  ;;  %714 = vrot.lane.b32.xlu1 %v641_v37, %s2985_s24  ;;  %v1418_v36 = vrot.slane %v1404_v33, %v3427_v11 }
 0x198   : > { %v3514_v26 = vpop.permute.xlu1 %800 }
 0x19a   : > { %2123 = vrot.lane.b32.xlu0 %v3502_v49, %s2981_s20  ;;  %722 = vrot.lane.b32.xlu1 %v642_v18, %s2984_s23  ;;  %v3615_v18 = vrot.slane %v1336_v52, %v3427_v11  ;;  %v1422_v52 = vcombine.high %v1418_v36, %v4687_v2 }
 0x19c   : > { %v3516_v54 = vpop.permute.xlu0 %804 }
 0x19e   : > { %1428 = vrot.lane.b32.xlu0 %v3519_v21, %s2981_s20  ;;  %730 = vrot.lane.b32.xlu1 %v643_v13, %s2986_s25  ;;  %v2114_v13 = vcombine.high %v3624_v47, %v4687_v2 }
 0x1a0   : > { %v3531_v25 = vpop.permute.xlu1 %808  ;;  %v3533_v63 = vpop.permute.xlu0 %1026 }
 0x1a2   : > { %2131 = vrot.lane.b32.xlu0 %v3539_v3, %s2982_s21  ;;  %2151 = vrot.lane.b32.xlu1 %v2097_v41, %s2981_s20 }
 0x1a4   : > { %v3550_v28 = vpop.permute.xlu1 %1030  ;;  %v3552_v62 = vpop.permute.xlu0 %1034 }
 0x1a6   : > { %1436 = vrot.lane.b32.xlu0 %v3555_v60, %s2982_s21  ;;  %1456 = vrot.lane.b32.xlu1 %v1402_v12, %s2981_s20  ;;  %v2049_v12 = vcombine.high %v2045_v27, %v4687_v2 }
 0x1a8   : > { %v3563_v0 = vpop.permute.xlu1 %1038  ;;  %v3565_v51 = vpop.permute.xlu0 %794 }
 0x1aa   : > { %2139 = vrot.lane.b32.xlu0 %v2045_v27, %s2983_s22  ;;  %2159 = vrot.lane.b32.xlu1 %v2106_v30, %s2982_s21  ;;  %v1421_v30 = vcombine.high %v1411_v55, %v4687_v2  ;;  %v902_v27 = vcombine.low %v3514_v26, %v3531_v25 }
 0x1ac   : > { %v3577_v35 = vpop.permute.xlu1 %798  ;;  %v3579_v24 = vpop.permute.xlu0 %802 }
 0x1ad   : > { %v818_v21 = vcombine.low %v3565_v51, %v3579_v24 }
 0x1ae   : > { %1472 = vrot.lane.b32.xlu0 %v1418_v36, %s2983_s22  ;;  %1464 = vrot.lane.b32.xlu1 %v1411_v55, %s2982_s21  ;;  %v910_v36 = vrot.slane %v902_v27, %v3217_v17 }
 0x1af   : > { %v3682_v42 = vrot.slane %v818_v21, %v3217_v17  ;;  %v1116_v21 = vcombine.low %v3533_v63, %v3552_v62 }
 0x1b0   : > { %v3595_v37 = vpop.permute.xlu1 %806  ;;  %v3597_v34 = vpop.permute.xlu0 %1024 }
 0x1b1   : > { %v834_v49 = vcombine.low %v3577_v35, %v3595_v37  ;;  %v835_v27 = vcombine.high %v3577_v35, %v3595_v37 }
 0x1b2   : > { %2119 = vrot.lane.b32.xlu0 %v2046_v43, %s2985_s24  ;;  %2167 = vrot.lane.b32.xlu1 %v2113_v5, %s2983_s22  ;;  %v903_v43 = vcombine.high %v3514_v26, %v3531_v25  ;;  %v887_v26 = vcombine.high %v3496_v48, %v3516_v54 }
 0x1b3   : > { %v3672_v1 = vrot.slane %v834_v49, %v3217_v17 }
 0x1b4   : > { %v3608_v7 = vpop.permute.xlu1 %1028  ;;  %v3610_v8 = vpop.permute.xlu0 %1032  ;;  %v917_v5 = vrot.slane %v903_v43, %v3217_v17 }
 0x1b5   : > { %v1048_v4 = vcombine.low %v3597_v34, %v3610_v8  ;;  %v851_v55 = vcombine.high %v3682_v42, %v3672_v1 }
 0x1b6   : > { %1452 = vrot.lane.b32.xlu0 %v1419_v16, %s2985_s24  ;;  %1444 = vrot.lane.b32.xlu1 %v3615_v18, %s2983_s22 }
 0x1b7   : > { %v3708_v25 = vrot.slane %v1048_v4, %v3217_v17 }
 0x1b8   : > { %v3629_v29 = vpop.permute.xlu1 %1036  ;;  %v3631_v20 = vpop.permute.xlu0 %2190 }
 0x1b9   : > { %v1064_v53 = vcombine.low %v3608_v7, %v3629_v29 }
 0x1ba   : > { %1424 = vrot.lane.b32.xlu0 %v1351_v22, %s2985_s24  ;;  %2147 = vrot.lane.b32.xlu1 %v2114_v13, %s2985_s24 }
 0x1bb   : > { %v3697_v16 = vrot.slane %v1064_v53, %v3217_v17  ;;  %v1354_v53 = vcombine.high %v3615_v18, %v4687_v2  ;;  %v819_v18 = vcombine.high %v3565_v51, %v3579_v24 }
 0x1bc   : > { %v3639_v58 = vpop.permute.xlu1 %2194  ;;  %v3641_v59 = vpop.permute.xlu0 %2198 }
 0x1be   : > { %2127 = vrot.lane.b32.xlu0 %v2047_v6, %s2984_s23  ;;  %2155 = vrot.lane.b32.xlu1 %v2115_v44, %s2984_s23  ;;  %v886_v6 = vcombine.low %v3496_v48, %v3516_v54  ;;  %v1353_v44 = vcombine.high %v3555_v60, %v4687_v2  ;;  %v1133_v48 = vcombine.high %v3550_v28, %v3563_v0 }
 0x1bf   : > { %v1081_v54 = vcombine.high %v3708_v25, %v3697_v16  ;;  %v901_v60 = vrot.slane %v887_v26, %v3217_v17  ;;  %v849_v26 = vrot.slane %v835_v27, %v3217_v17 }
 0x1c0   : > { %v3648_v45 = vpop.permute.xlu1 %2202  ;;  %v3650_v57 = vpop.permute.xlu0 %2188  ;;  %v1147_v4 = vrot.slane %v1133_v48, %v3217_v17  ;;  %v1049_v48 = vcombine.high %v3597_v34, %v3610_v8 }
 0x1c2   : > { %1432 = vrot.lane.b32.xlu0 %v1352_v61, %s2984_s23  ;;  %1460 = vrot.lane.b32.xlu1 %v1420_v9, %s2984_s23  ;;  %v1132_v61 = vcombine.low %v3550_v28, %v3563_v0  ;;  %v1117_v28 = vcombine.high %v3533_v63, %v3552_v62  ;;  %v3751_v62 = vrot.slane %v1081_v54, %v3427_v11 }
 0x1c3   : > { %v935_v54 = vcombine.high %v901_v60, %v917_v5  ;;  %v1063_v34 = vrot.slane %v1049_v48, %v3217_v17 }
 0x1c4   : > { %v3659_v41 = vpop.permute.xlu1 %2192  ;;  %v3661_v46 = vpop.permute.xlu0 %2196 }
 0x1c6   : > { %2135 = vrot.lane.b32.xlu0 %v2048_v10, %s2986_s25  ;;  %2163 = vrot.lane.b32.xlu1 %v2116_v40, %s2986_s25  ;;  %v3727_v10 = vrot.slane %v851_v55, %v3427_v11  ;;  %v894_v40 = vrot.slane %v886_v6, %v3217_v17  ;;  %v1131_v55 = vrot.slane %v1117_v28, %v3217_v17 }
 0x1c8   : > { %v3676_v33 = vpop.permute.xlu1 %2200  ;;  %v3678_v3 = vpop.permute.xlu0 %2420  ;;  %v919_v0 = vcombine.high %v894_v40, %v910_v36  ;;  %v1164_v6 = vcombine.low %v1131_v55, %v1147_v4  ;;  %v918_v8 = vcombine.low %v894_v40, %v910_v36  ;;  %v850_v36 = vcombine.low %v3682_v42, %v3672_v1 }
 0x1c9   : > { %v1080_v42 = vcombine.low %v3708_v25, %v3697_v16 }
 0x1ca   : > { %2143 = vrot.lane.b32.xlu0 %v2049_v12, %s2987_s28  ;;  %1468 = vrot.lane.b32.xlu1 %v1421_v30, %s2986_s25  ;;  %v934_v12 = vcombine.low %v901_v60, %v917_v5  ;;  %v3741_v30 = vrot.slane %v1132_v61, %v3217_v17  ;;  %v3761_v35 = vrot.slane %v919_v0, %v3427_v11 }
 0x1cb   : > { %v833_v61 = vrot.slane %v819_v18, %v3217_v17 }
 0x1cc   : > { %v3699_v22 = vpop.permute.xlu1 %2424  ;;  %v3701_v13 = vpop.permute.xlu0 %2428  ;;  %v3764_v37 = vrot.slane %v934_v12, %v3427_v11  ;;  %v1172_v12 = vrot.slane %v1164_v6, %v3427_v11  ;;  %v3803_v6 = vrot.slane %v918_v8, %v3427_v11 }
 0x1cd   : > { %v867_v40 = vcombine.high %v833_v61, %v849_v26 }
 0x1ce   : > { %1476 = vrot.lane.b32.xlu0 %v1422_v52, %s2987_s28  ;;  %2171 = vrot.lane.b32.xlu1 %v2117_v14, %s2987_s28  ;;  %v1124_v52 = vrot.slane %v1116_v21, %v3217_v17  ;;  %v866_v21 = vcombine.low %v833_v61, %v849_v26  ;;  %4709 = vst [vmem:[#allocation9_spill] sm:$0xff] %v3803_v6 }
 0x1cf   : > { %v950_v1 = vcombine.high %v3803_v6, %v4687_v2  ;;  %v3828_v8 = vrot.slane %v867_v40, %v3427_v11 }
 0x1d0   : > { %v3722_v9 = vpop.permute.xlu1 %2432  ;;  %v3724_v49 = vpop.permute.xlu0 %1725  ;;  %v1149_v14 = vcombine.high %v1124_v52, %v3741_v30  ;;  %v3796_v18 = vrot.slane %v866_v21, %v3427_v11 }
 0x1d2   : > { %1440 = vrot.lane.b32.xlu1 %v1353_v44, %s2986_s25  ;;  %959 = vrot.lane.b32.xlu0 %v3727_v10, %s2981_s20  ;;  %v1065_v44 = vcombine.high %v3608_v7, %v3629_v29  ;;  %v1163_v0 = vrot.slane %v1149_v14, %v3427_v11  ;;  %v949_v14 = vrot.slane %v935_v54, %v3427_v11 }
 0x1d3   : > { %v1148_v54 = vcombine.low %v1124_v52, %v3741_v30 }
 0x1d4   : > { %v3746_v43 = vpop.permute.xlu1 %1729  ;;  %v3748_v63 = vpop.permute.xlu0 %1733  ;;  %v1079_v28 = vrot.slane %v1065_v44, %v3217_v17 }
 0x1d6   : > { %1448 = vrot.lane.b32.xlu1 %v1354_v53, %s2987_s28  ;;  %1189 = vrot.lane.b32.xlu0 %v3751_v62, %s2981_s20  ;;  %v1165_v53 = vcombine.high %v1131_v55, %v1147_v4  ;;  %v1096_v5 = vcombine.low %v1063_v34, %v1079_v28  ;;  %v1097_v26 = vcombine.high %v1063_v34, %v1079_v28 }
 0x1d7   : > { %v3844_v28 = vrot.slane %v1148_v54, %v3427_v11  ;;  %v3847_v34 = vrot.slane %v1080_v42, %v3427_v11 }
 0x1d8   : > { %v3770_v51 = vpop.permute.xlu1 %1737  ;;  %v3772_v24 = vpop.permute.xlu0 %2418  ;;  %v3812_v44 = vrot.slane %v1096_v5, %v3427_v11  ;;  %v1179_v48 = vrot.slane %v1165_v53, %v3427_v11  ;;  %v3831_v53 = vrot.slane %v850_v36, %v3427_v11  ;;  %v1111_v16 = vrot.slane %v1097_v26, %v3427_v11 }
 0x1d9   : > { %4711 = vst [vmem:[#allocation11_spill] sm:$0xff] %v3844_v28  ;;  %4712 = vst [vmem:[#allocation12_spill] sm:$0xff] %v3847_v34  ;;  %v1180_v40 = vcombine.high %v3844_v28, %v4687_v2  ;;  %v951_v26 = vcombine.high %v3761_v35, %v4687_v2  ;;  %v1831_v32 = vcombine.low %v3746_v43, %v3770_v51 }
 0x1da   : > { %987 = vrot.lane.b32.xlu1 %v3761_v35, %s2981_s20  ;;  %995 = vrot.lane.b32.xlu0 %v3764_v37, %s2982_s21  ;;  %4710 = vst [vmem:[#allocation10_spill] sm:$0xff] %v3831_v53  ;;  %v882_v25 = vcombine.high %v3831_v53, %v4687_v2  ;;  %v2296_v35 = vcombine.low %v3639_v58, %v3648_v45 }
 0x1dc   : > { %v3782_v7 = vpop.permute.xlu1 %2422  ;;  %v3784_v29 = vpop.permute.xlu0 %2426 }
 0x1de   : > { %1217 = vrot.lane.b32.xlu1 %v1163_v0, %s2981_s20  ;;  %1225 = vrot.lane.b32.xlu0 %v1172_v12, %s2982_s21 }
 0x1e0   : > { %v3791_v60 = vpop.permute.xlu1 %2430  ;;  %v3793_v27 = vpop.permute.xlu0 %1723 }
 0x1e2   : > { %967 = vrot.lane.b32.xlu1 %v3796_v18, %s2982_s21  ;;  %1003 = vrot.lane.b32.xlu0 %v949_v14, %s2983_s22 }
 0x1e4   : > { %v3807_v4 = vpop.permute.xlu1 %1727  ;;  %v3809_v55 = vpop.permute.xlu0 %1731 }
 0x1e6   : > { %1197 = vrot.lane.b32.xlu1 %v3812_v44, %s2982_s21  ;;  %1233 = vrot.lane.b32.xlu0 %v1179_v48, %s2983_s22 }
 0x1e8   : > { %v3823_v61 = vpop.permute.xlu1 %1735  ;;  %v3825_v21 = vpop.permute.xlu0 %1495 }
 0x1ea   : > { %975 = vrot.lane.b32.xlu1 %v3828_v8, %s2983_s22  ;;  %983 = vrot.lane.b32.xlu0 %v950_v1, %s2985_s24  ;;  %v1112_v1 = vcombine.high %v3847_v34, %v4687_v2 }
 0x1ec   : > { %v3836_v30 = vpop.permute.xlu1 %1499  ;;  %v3838_v52 = vpop.permute.xlu0 %1503 }
 0x1ee   : > { %1205 = vrot.lane.b32.xlu1 %v1111_v16, %s2983_s22  ;;  %955 = vrot.lane.b32.xlu0 %v882_v25, %s2985_s24  ;;  %v952_v25 = vcombine.high %v3764_v37, %v4687_v2 }
 0x1f0   : > { %v3851_v5 = vpop.permute.xlu1 %1507  ;;  %v3853_v36 = vpop.permute.xlu0 %1493 }
 0x1f2   : > { %1213 = vrot.lane.b32.xlu1 %v1180_v40, %s2985_s24  ;;  %1185 = vrot.lane.b32.xlu0 %v1112_v1, %s2985_s24  ;;  %v1181_v40 = vcombine.high %v1163_v0, %v4687_v2  ;;  %v1182_v1 = vcombine.high %v1172_v12, %v4687_v2  ;;  %v2280_v0 = vcombine.low %v3631_v20, %v3641_v59 }
 0x1f3   : > { %v3893_v12 = vrot.slane %v2296_v35, %v3217_v17 }
 0x1f4   : > { %v3861_v54 = vpop.permute.xlu1 %1497  ;;  %v3863_v42 = vpop.permute.xlu0 %1501 }
 0x1f6   : > { %991 = vrot.lane.b32.xlu1 %v951_v26, %s2984_s23  ;;  %999 = vrot.lane.b32.xlu0 %v952_v25, %s2986_s25  ;;  %v883_v25 = vcombine.high %v3727_v10, %v4687_v2  ;;  %v1113_v10 = vcombine.high %v3751_v62, %v4687_v2 }
 0x1f8   : > { %v3871_v15 = vpop.permute.xlu1 %1505  ;;  %v3873_v23 = vpop.permute.xlu0 %746 }
 0x1f9   : > { %4713 = vst [vmem:[#allocation13_spill] sm:$0xff] %v3873_v23  ;;  %v953_v23 = vcombine.high %v949_v14, %v4687_v2  ;;  %v1183_v14 = vcombine.high %v1179_v48, %v4687_v2  ;;  %v2526_v48 = vcombine.low %v3699_v22, %v3722_v9 }
 0x1fa   : > { %1221 = vrot.lane.b32.xlu1 %v1181_v40, %s2984_s23  ;;  %1229 = vrot.lane.b32.xlu0 %v1182_v1, %s2986_s25  ;;  %v2228_v40 = vcombine.low %v3659_v41, %v3676_v33 }
 0x1fc   : > { %v3881_v37 = vpop.permute.xlu1 %718  ;;  %v3883_v26 = vpop.permute.xlu0 %754  ;;  %v3916_v62 = vrot.slane %v2228_v40, %v3217_v17  ;;  %v2442_v40 = vcombine.low %v3772_v24, %v3784_v29 }
 0x1fd   : > { %4714 = vst [vmem:[#allocation14_spill] sm:$0xff] %v3881_v37  ;;  %4715 = vst [vmem:[#allocation15_spill] sm:$0xff] %v3883_v26  ;;  %v3905_v26 = vrot.slane %v2280_v0, %v3217_v17  ;;  %v2458_v0 = vcombine.low %v3782_v7, %v3791_v60 }
 0x1fe   : > { %963 = vrot.lane.b32.xlu1 %v883_v25, %s2984_s23  ;;  %1007 = vrot.lane.b32.xlu0 %v953_v23, %s2987_s28  ;;  %v2212_v23 = vcombine.low %v3650_v57, %v3661_v46  ;;  %v884_v25 = vcombine.high %v3796_v18, %v4687_v2  ;;  %v2510_v18 = vcombine.low %v3678_v3, %v3701_v13 }
 0x1ff   : > { %v2313_v35 = vcombine.high %v3905_v26, %v3893_v12  ;;  %v3949_v39 = vrot.slane %v2458_v0, %v3217_v17  ;;  %v2297_v0 = vcombine.high %v3639_v58, %v3648_v45 }
 0x200   : > { %v3897_v1 = vpop.permute.xlu1 %726  ;;  %v3899_v37 = vpop.permute.xlu0 %762 }
 0x201   : > { %4716 = vst [vmem:[#allocation16_spill] sm:$0xff] %v3897_v1  ;;  %4717 = vst [vmem:[#allocation17_spill] sm:$0xff] %v3899_v37  ;;  %v3928_v37 = vrot.slane %v2212_v23, %v3217_v17 }
 0x202   : > { %1193 = vrot.lane.b32.xlu1 %v1113_v10, %s2984_s23  ;;  %1237 = vrot.lane.b32.xlu0 %v1183_v14, %s2987_s28  ;;  %v1115_v14 = vcombine.high %v1111_v16, %v4687_v2  ;;  %v3941_v16 = vrot.slane %v2313_v35, %v3427_v11  ;;  %v3960_v35 = vrot.slane %v2510_v18, %v3217_v17 }
 0x203   : > { %v2245_v23 = vcombine.high %v3928_v37, %v3916_v62  ;;  %v3975_v18 = vrot.slane %v1831_v32, %v3217_v17  ;;  %v2281_v32 = vcombine.high %v3631_v20, %v3641_v59  ;;  %v2527_v20 = vcombine.high %v3699_v22, %v3722_v9 }
 0x204   : > { %v3922_v1 = vpop.permute.xlu1 %742  ;;  %v3924_v10 = vpop.permute.xlu0 %750 }
 0x205   : > { %4718 = vst [vmem:[#allocation18_spill] sm:$0xff] %v3922_v1  ;;  %4719 = vst [vmem:[#allocation19_spill] sm:$0xff] %v3924_v10  ;;  %v1114_v10 = vcombine.high %v3812_v44, %v4687_v2  ;;  %v3946_v1 = vrot.slane %v2526_v48, %v3217_v17  ;;  %v1815_v44 = vcombine.low %v3724_v49, %v3748_v63 }
 0x206   : > { %971 = vrot.lane.b32.xlu1 %v884_v25, %s2986_s25  ;;  %1209 = vrot.lane.b32.xlu0 %v1115_v14, %s2987_s28  ;;  %v1763_v25 = vcombine.low %v3807_v4, %v3823_v61  ;;  %v3963_v2 = vrot.slane %v2442_v40, %v3217_v17  ;;  %v1747_v48 = vcombine.low %v3793_v27, %v3809_v55 }
 0x207   : > { %v2543_v31 = vcombine.high %v3960_v35, %v3946_v1  ;;  %v3991_v45 = vrot.slane %v2245_v23, %v3427_v11  ;;  %v4007_v23 = vrot.slane %v2297_v0, %v3217_v17  ;;  %v4031_v22 = vrot.slane %v2281_v32, %v3217_v17 }
 0x208   : > { %v3953_v14 = vpop.permute.xlu1 %714  ;;  %v3955_v38 = vpop.permute.xlu0 %758  ;;  %v3984_v34 = vrot.slane %v1763_v25, %v3217_v17 }
 0x209   : > { %4720 = vst [vmem:[#allocation20_spill] sm:$0xff] %v3953_v14  ;;  %4721 = vst [vmem:[#allocation21_spill] sm:$0xff] %v3955_v38  ;;  %v2229_v38 = vcombine.high %v3659_v41, %v3676_v33  ;;  %v4722_v14 = vmov 0.0   ;;  %v2213_v41 = vcombine.high %v3650_v57, %v3661_v46  ;;  %v3998_v33 = vrot.slane %v1815_v44, %v3217_v17 }
 0x20a   : > { %1201 = vrot.lane.b32.xlu1 %v1114_v10, %s2986_s25  ;;  %2381 = vrot.lane.b32.xlu0 %v3941_v16, %s2981_s20  ;;  %v885_v40 = vcombine.high %v3828_v8, %v4722_v14  ;;  %v2475_v10 = vcombine.high %v3963_v2, %v3949_v39  ;;  %v4001_v8 = vrot.slane %v1747_v48, %v3217_v17 }
 0x20b   : > { %v4010_v25 = vrot.slane %v2229_v38, %v3217_v17  ;;  %v1848_v59 = vcombine.high %v3998_v33, %v3975_v18  ;;  %v2459_v57 = vcombine.high %v3782_v7, %v3791_v60  ;;  %v4025_v0 = vrot.slane %v2543_v31, %v3427_v11 }
 0x20c   : > { %v3986_v28 = vpop.permute.xlu1 %722  ;;  %v3988_v58 = vpop.permute.xlu0 %2123  ;;  %v1780_v46 = vcombine.high %v4001_v8, %v3984_v34  ;;  %v4028_v38 = vrot.slane %v2475_v10, %v3427_v11  ;;  %v4034_v9 = vrot.slane %v2213_v41, %v3217_v17  ;;  %v2511_v7 = vcombine.high %v3678_v3, %v3701_v13 }
 0x20d   : > { %4723 = vst [vmem:[#allocation22_spill] sm:$0xff] %v3986_v28  ;;  %4725 = vst [vmem:[#allocation24_spill] sm:$0xff] %v4025_v0  ;;  %v2443_v60 = vcombine.high %v3772_v24, %v3784_v29  ;;  %v2328_v31 = vcombine.low %v4031_v22, %v4007_v23  ;;  %v4049_v10 = vrot.slane %v2527_v20, %v3217_v17 }
 0x20e   : > { %979 = vrot.lane.b32.xlu1 %v885_v40, %s2987_s28  ;;  %2353 = vrot.lane.b32.xlu0 %v3991_v45, %s2981_s20  ;;  %4726 = vst [vmem:[#allocation25_spill] sm:$0xff] %v4028_v38  ;;  %v2260_v40 = vcombine.low %v4034_v9, %v4010_v25  ;;  %v4052_v3 = vrot.slane %v1848_v59, %v3427_v11 }
 0x20f   : > { %v4055_v13 = vrot.slane %v2459_v57, %v3217_v17  ;;  %v1601_v24 = vcombine.low %v3836_v30, %v3851_v5  ;;  %v1533_v29 = vcombine.low %v3861_v54, %v3871_v15  ;;  %v4069_v20 = vrot.slane %v2511_v7, %v3217_v17 }
 0x210   : > { %v4020_v44 = vpop.permute.xlu1 %730  ;;  %v4022_v48 = vpop.permute.xlu0 %1428  ;;  %4727 = vst [vmem:[#allocation26_spill] sm:$0xff] %v4052_v3  ;;  %v4072_v59 = vrot.slane %v2443_v60, %v3217_v17  ;;  %v1585_v57 = vcombine.low %v3825_v21, %v3838_v52  ;;  %v1517_v28 = vcombine.low %v3853_v36, %v3863_v42  ;;  %v1832_v7 = vcombine.high %v3746_v43, %v3770_v51 }
 0x211   : > { %4724 = vst [vmem:[#allocation23_spill] sm:$0xff] %v4020_v44  ;;  %v4066_v44 = vrot.slane %v1780_v46, %v3427_v11  ;;  %v2558_v46 = vcombine.low %v4069_v20, %v4049_v10  ;;  %v4087_v60 = vrot.slane %v2328_v31, %v3427_v11  ;;  %v4090_v53 = vrot.slane %v2260_v40, %v3427_v11 }
 0x212   : > { %2611 = vrot.lane.b32.xlu1 %v4025_v0, %s2981_s20  ;;  %2583 = vrot.lane.b32.xlu0 %v4028_v38, %s2981_s20  ;;  %v2490_v6 = vcombine.low %v4072_v59, %v4055_v13  ;;  %v4100_v38 = vrot.slane %v1533_v29, %v3217_v17  ;;  %v1816_v51 = vcombine.high %v3724_v49, %v3748_v63 }
 0x213   : > { %4728 = vst [vmem:[#allocation27_spill] sm:$0xff] %v4066_v44  ;;  %4729 = vst [vmem:[#allocation28_spill] sm:$0xff] %v4087_v60  ;;  %v1748_v31 = vcombine.high %v3793_v27, %v3809_v55  ;;  %v4111_v40 = vrot.slane %v1585_v57, %v3217_v17  ;;  %v4124_v49 = vrot.slane %v2558_v46, %v3427_v11 }
 0x214   : > { %v4061_v32 = vpop.permute.xlu1 %2151  ;;  %v4063_v41 = vpop.permute.xlu0 %2131  ;;  %4730 = vst [vmem:[#allocation29_spill] sm:$0xff] %v4090_v53  ;;  %v4136_v29 = vrot.slane %v2490_v6, %v3427_v11  ;;  %v4139_v57 = vrot.slane %v1816_v51, %v3217_v17 }
 0x215   : > { %4731 = vst [vmem:[#allocation30_spill] sm:$0xff] %v4124_v49  ;;  %v1762_v46 = vrot.slane %v1748_v31, %v3217_v17 }
 0x216   : > { %1916 = vrot.lane.b32.xlu1 %v4052_v3, %s2981_s20  ;;  %1888 = vrot.lane.b32.xlu0 %v4066_v44, %s2981_s20  ;;  %v1764_v3 = vcombine.high %v3807_v4, %v3823_v61  ;;  %v4097_v44 = vrot.slane %v1601_v24, %v3217_v17  ;;  %v4114_v4 = vrot.slane %v1517_v28, %v3217_v17 }
 0x217   : > { %v4121_v61 = vrot.slane %v1832_v7, %v3217_v17  ;;  %4732 = vst [vmem:[#allocation31_spill] sm:$0xff] %v4136_v29 }
 0x218   : > { %v4102_v0 = vpop.permute.xlu1 %1456  ;;  %v4104_v43 = vpop.permute.xlu0 %1436  ;;  %v1778_v63 = vrot.slane %v1764_v3, %v3217_v17  ;;  %v1618_v27 = vcombine.high %v4111_v40, %v4097_v44  ;;  %v1550_v55 = vcombine.high %v4114_v4, %v4100_v38 }
 0x219   : > { %v1863_v3 = vcombine.low %v4139_v57, %v4121_v61 }
 0x21a   : > { %2389 = vrot.lane.b32.xlu1 %v4087_v60, %s2982_s21  ;;  %2361 = vrot.lane.b32.xlu0 %v4090_v53, %s2982_s21  ;;  %v1795_v7 = vcombine.low %v1762_v46, %v1778_v63  ;;  %v1534_v53 = vcombine.high %v3861_v54, %v3871_v15  ;;  %v4155_v51 = vrot.slane %v1618_v27, %v3427_v11 }
 0x21b   : > { %v4158_v31 = vrot.slane %v1550_v55, %v3427_v11  ;;  %v2329_v15 = vcombine.high %v4031_v22, %v4007_v23  ;;  %v2261_v54 = vcombine.high %v4034_v9, %v4010_v25  ;;  %v1602_v27 = vcombine.high %v3836_v30, %v3851_v5 }
 0x21c   : > { %v4131_v28 = vpop.permute.xlu1 %2159  ;;  %v4133_v24 = vpop.permute.xlu0 %2139  ;;  %v4173_v55 = vrot.slane %v1534_v53, %v3217_v17  ;;  %v1586_v23 = vcombine.high %v3825_v21, %v3838_v52  ;;  %v2559_v30 = vcombine.high %v4069_v20, %v4049_v10  ;;  %v1796_v10 = vcombine.high %v1762_v46, %v1778_v63 }
 0x21d   : > { %4733 = vst [vmem:[#allocation32_spill] sm:$0xff] %v4158_v31  ;;  %v4193_v53 = vrot.slane %v2329_v15, %v3427_v11  ;;  %v1616_v5 = vrot.slane %v1602_v27, %v3217_v17  ;;  %v4203_v9 = vrot.slane %v2261_v54, %v3427_v11  ;;  %v1864_v63 = vcombine.high %v4139_v57, %v4121_v61 }
 0x21e   : > { %2619 = vrot.lane.b32.xlu1 %v4124_v49, %s2982_s21  ;;  %2591 = vrot.lane.b32.xlu0 %v4136_v29, %s2982_s21  ;;  %v1518_v29 = vcombine.high %v3853_v36, %v3863_v42  ;;  %v4178_v42 = vrot.slane %v1863_v3, %v3427_v11  ;;  %v4213_v15 = vrot.slane %v2559_v30, %v3427_v11 }
 0x220   : > { %v4150_v6 = vpop.permute.xlu1 %1464  ;;  %v4152_v60 = vpop.permute.xlu0 %1472  ;;  %v4186_v25 = vrot.slane %v1518_v29, %v3217_v17  ;;  %v1600_v29 = vrot.slane %v1586_v23, %v3217_v17  ;;  %4734 = vst [vmem:[#allocation33_spill] sm:$0xff] %v4213_v15  ;;  %v2312_v17 = vcombine.low %v3905_v26, %v3893_v12  ;;  %v1847_v26 = vcombine.low %v3998_v33, %v3975_v18 }
 0x221   : > { %v2491_v12 = vcombine.high %v4072_v59, %v4055_v13  ;;  %v2244_v59 = vcombine.low %v3928_v37, %v3916_v62 }
 0x222   : > { %1686 = vrot.lane.b32.xlu1 %v4155_v51, %s2981_s20  ;;  %1658 = vrot.lane.b32.xlu0 %v4158_v31, %s2981_s20  ;;  %v4181_v31 = vrot.slane %v1795_v7, %v3427_v11  ;;  %v1565_v21 = vcombine.low %v4186_v25, %v4173_v55  ;;  %v1633_v20 = vcombine.low %v1600_v29, %v1616_v5 }
 0x223   : > { %v1634_v46 = vcombine.high %v1600_v29, %v1616_v5  ;;  %v4243_v61 = vrot.slane %v2312_v17, %v3427_v11  ;;  %v4248_v5 = vrot.slane %v1864_v63, %v3427_v11  ;;  %v1566_v37 = vcombine.high %v4186_v25, %v4173_v55 }
 0x224   : > { %v4175_v49 = vpop.permute.xlu1 %2167  ;;  %v2120_v36 = vpop.permute.xlu0 %2119  ;;  %v4216_v27 = vrot.slane %v1565_v21, %v3427_v11  ;;  %v4227_v30 = vrot.slane %v1633_v20, %v3427_v11  ;;  %v4230_v21 = vrot.slane %v1796_v10, %v3427_v11 }
 0x225   : > { %v4251_v29 = vrot.slane %v1634_v46, %v3427_v11 }
 0x226   : > { %1924 = vrot.lane.b32.xlu1 %v4178_v42, %s2982_s21  ;;  %1896 = vrot.lane.b32.xlu0 %v4181_v31, %s2982_s21 }
 0x228   : > { %v4200_v52 = vpop.permute.xlu1 %1444  ;;  %v1453_v22 = vpop.permute.xlu0 %1452 }
 0x229   : > { %v1486_v18 = vsel %vm769_vm13, %v3602_v50, %v1453_v22  ;;  %v4267_v50 = vrot.slane %v2491_v12, %v3427_v11  ;;  %v4272_v22 = vrot.slane %v1847_v26, %v3427_v11 }
 0x22a   : > { %2397 = vrot.lane.b32.xlu1 %v4193_v53, %s2983_s22  ;;  %2369 = vrot.lane.b32.xlu0 %v4203_v9, %s2983_s22  ;;  %v1487_v10 = vsel %vm771_vm14, %v1486_v18, %v4102_v0  ;;  %v4289_v0 = vrot.slane %v2244_v59, %v3427_v11 }
 0x22b   : > { %v1879_v55 = vcombine.high %v4272_v22, %v4722_v14 }
 0x22c   : > { %v2148_v3 = vpop.permute.xlu1 %2147  ;;  %v4210_v7 = vpop.permute.xlu0 %1424 }
 0x22d   : > { %v2181_v33 = vsel %vm769_vm13, %v3624_v47, %v2148_v3  ;;  %v2344_v47 = vcombine.high %v4243_v61, %v4722_v14 }
 0x22e   : > { %2627 = vrot.lane.b32.xlu1 %v4213_v15, %s2983_s22  ;;  %1666 = vrot.lane.b32.xlu0 %v4216_v27, %s2982_s21  ;;  %v2174_v15 = vsel %vm769_vm13, %v3587_v56, %v2120_v36  ;;  %v2182_v62 = vsel %vm771_vm14, %v2181_v33, %v4061_v32  ;;  %v2542_v32 = vcombine.low %v3960_v35, %v3946_v1 }
 0x22f   : > { %v2175_v56 = vsel %vm771_vm14, %v2174_v15, %v3988_v58  ;;  %v2474_v58 = vcombine.low %v3963_v2, %v3949_v39  ;;  %v4307_v35 = vrot.slane %v1566_v37, %v3427_v11 }
 0x230   : > { %v2156_v54 = vpop.permute.xlu1 %2155  ;;  %v2128_v23 = vpop.permute.xlu0 %2127 }
 0x231   : > { %v2176_v13 = vsel %vm773_vm15, %v2175_v56, %v2128_v23  ;;  %v2183_v3 = vsel %vm773_vm15, %v2182_v62, %v2156_v54  ;;  %v4298_v25 = vrot.slane %v2474_v58, %v3427_v11  ;;  %v2345_v62 = vcombine.high %v3941_v16, %v4722_v14 }
 0x232   : > { %1694 = vrot.lane.b32.xlu1 %v4227_v30, %s2982_s21  ;;  %1904 = vrot.lane.b32.xlu0 %v4230_v21, %s2983_s22  ;;  %v2177_v2 = vsel %vm775_vm0, %v2176_v13, %v4063_v41  ;;  %v1779_v41 = vcombine.low %v4001_v8, %v3984_v34  ;;  %v2184_v63 = vsel %vm775_vm0, %v2183_v3, %v4131_v28 }
 0x233   : > { %v1479_v34 = vsel %vm769_vm13, %v3618_v19, %v4210_v7  ;;  %v4325_v19 = vrot.slane %v2542_v32, %v3427_v11  ;;  %v2277_v3 = vcombine.high %v3991_v45, %v4722_v14 }
 0x234   : > { %v1461_v57 = vpop.permute.xlu1 %1460  ;;  %v1433_v36 = vpop.permute.xlu0 %1432  ;;  %v1480_v7 = vsel %vm771_vm14, %v1479_v34, %v4022_v48  ;;  %v4334_v33 = vrot.slane %v1779_v41, %v3427_v11  ;;  %v4738_v34 = vld [vmem:[#allocation27_spill] sm:$0xff] }
 0x235   : > { %v1488_v15 = vsel %vm773_vm15, %v1487_v10, %v1461_v57  ;;  %v1481_v13 = vsel %vm773_vm15, %v1480_v7, %v1433_v36  ;;  %v1617_v10 = vcombine.low %v4111_v40, %v4097_v44  ;;  %v4735_v40 = vld [vmem:[#allocation24_spill] sm:$0xff] }
 0x236   : > { %1932 = vrot.lane.b32.xlu1 %v4248_v5, %s2983_s22  ;;  %1702 = vrot.lane.b32.xlu0 %v4251_v29, %s2983_s22  ;;  %v1489_v54 = vsel %vm775_vm0, %v1488_v15, %v4150_v6  ;;  %v2506_v6 = vcombine.high %v4298_v25, %v4722_v14  ;;  %v1811_v36 = vcombine.high %v4334_v33, %v4722_v14 }
 0x238   : > { %v2164_v20 = vpop.permute.xlu1 %2163  ;;  %v2136_v39 = vpop.permute.xlu0 %2135 }
 0x239   : > { %v2178_v17 = vsel %vm777_vm1, %v2177_v2, %v2136_v39  ;;  %v2185_v8 = vsel %vm777_vm1, %v2184_v63, %v2164_v20 }
 0x23a   : > { %2599 = vrot.lane.b32.xlu1 %v4267_v50, %s2983_s22  ;;  %2377 = vrot.lane.b32.xlu0 %v2344_v47, %s2985_s24  ;;  %v2179_v23 = vsel %vm779_vm2, %v2178_v17, %v4133_v24  ;;  %v2276_v24 = vcombine.high %v4289_v0, %v4722_v14  ;;  %v2186_v12 = vsel %vm779_vm2, %v2185_v8, %v4175_v49 }
 0x23b   : > { %v2574_v47 = vcombine.high %v4325_v19, %v4722_v14  ;;  %v1812_v8 = vcombine.high %v4738_v34, %v4722_v14 }
 0x23c   : > { %v1469_v46 = vpop.permute.xlu1 %1468  ;;  %v2144_v1 = vpop.permute.xlu0 %2143 }
 0x23d   : > { %v1490_v26 = vsel %vm777_vm1, %v1489_v54, %v1469_v46  ;;  %v4315_v28 = vsel %vm781_vm3, %v2179_v23, %v2144_v1  ;;  %v4737_v23 = vld [vmem:[#allocation26_spill] sm:$0xff] }
 0x23e   : > { %1674 = vrot.lane.b32.xlu1 %v4307_v35, %s2983_s22  ;;  %1912 = vrot.lane.b32.xlu0 %v1879_v55, %s2985_s24  ;;  %v1491_v57 = vsel %vm779_vm2, %v1490_v26, %v4152_v60  ;;  %v1482_v60 = vsel %vm775_vm0, %v1481_v13, %v4104_v43  ;;  %v1549_v43 = vcombine.low %v4114_v4, %v4100_v38  ;;  %v4736_v4 = vld [vmem:[#allocation25_spill] sm:$0xff]  ;;  %v4741_v13 = vld [vmem:[#allocation30_spill] sm:$0xff] }
 0x23f   : > { %v2575_v38 = vcombine.high %v4735_v40, %v4722_v14  ;;  %v2507_v17 = vcombine.high %v4736_v4, %v4722_v14  ;;  %v1880_v1 = vcombine.high %v4737_v23, %v4722_v14  ;;  %v4745_v40 = vld [vmem:[#allocation10_spill] sm:$0xff] }
 0x240   : > { %v2172_v56 = vpop.permute.xlu1 %2171  ;;  %v1477_v18 = vpop.permute.xlu0 %1476  ;;  %v4377_v45 = vrot.slane %v1549_v43, %v3427_v11 }
 0x241   : > { %v4338_v59 = vsel %vm781_vm3, %v2186_v12, %v2172_v56  ;;  %v4341_v58 = vsel %vm781_vm3, %v1491_v57, %v1477_v18  ;;  %v4740_v12 = vld [vmem:[#allocation29_spill] sm:$0xff] }
 0x242   : > { %2349 = vrot.lane.b32.xlu1 %v2276_v24, %s2985_s24  ;;  %2579 = vrot.lane.b32.xlu0 %v2506_v6, %s2985_s24  ;;  %v1581_v63 = vcombine.high %v4377_v45, %v4722_v14  ;;  %v4739_v6 = vld [vmem:[#allocation28_spill] sm:$0xff]  ;;  %v2278_v56 = vcombine.high %v4740_v12, %v4722_v14 }
 0x243   : > { %v2346_v7 = vcombine.high %v4739_v6, %v4722_v14 }
 0x244   : > { %v1441_v48 = vpop.permute.xlu1 %1440  ;;  %v960_v49 = vpop.permute.xlu0 %959 }
 0x245   : > { %v1483_v37 = vsel %vm777_vm1, %v1482_v60, %v1441_v48  ;;  %v2576_v48 = vcombine.high %v4741_v13, %v4722_v14  ;;  %v4742_v60 = vld [vmem:[#allocation31_spill] sm:$0xff]  ;;  %v1651_v13 = vcombine.high %v4227_v30, %v4722_v14  ;;  %v1882_v30 = vcombine.high %v4248_v5, %v4722_v14 }
 0x246   : > { %2607 = vrot.lane.b32.xlu1 %v2574_v47, %s2985_s24  ;;  %1884 = vrot.lane.b32.xlu0 %v1811_v36, %s2985_s24  ;;  %v1484_v2 = vsel %vm779_vm2, %v1483_v37, %v4200_v52  ;;  %v4374_v52 = vrot.slane %v1617_v10, %v3427_v11  ;;  %v2508_v47 = vcombine.high %v4742_v60, %v4722_v14  ;;  %v4743_v36 = vld [vmem:[#allocation9_spill] sm:$0xff]  ;;  %v2657_v5 = vrot.slane %v4341_v58, 4 }
 0x248   : > { %v1449_v20 = vpop.permute.xlu1 %1448  ;;  %v1190_v39 = vpop.permute.xlu0 %1189  ;;  %v1649_v55 = vcombine.high %v4374_v52, %v4722_v14 }
 0x249   : > { %v4365_v15 = vsel %vm781_vm3, %v1484_v2, %v1449_v20  ;;  %v1650_v20 = vcombine.high %v4155_v51, %v4722_v14  ;;  %v4744_v2 = vld [vmem:[#allocation32_spill] sm:$0xff]  ;;  %v1813_v51 = vcombine.high %v4181_v31, %v4722_v14  ;;  %v2279_v31 = vcombine.high %v4203_v9, %v4722_v14 }
 0x24a   : > { %2385 = vrot.lane.b32.xlu1 %v2345_v62, %s2984_s23  ;;  %2357 = vrot.lane.b32.xlu0 %v2277_v3, %s2984_s23  ;;  %v1582_v3 = vcombine.high %v4744_v2, %v4722_v14 }
 0x24c   : > { %v988_v16 = vpop.permute.xlu1 %987  ;;  %v996_v44 = vpop.permute.xlu0 %995 }
 0x24e   : > { %2615 = vrot.lane.b32.xlu1 %v2575_v38, %s2984_s23  ;;  %2587 = vrot.lane.b32.xlu0 %v2507_v17, %s2984_s23 }
 0x250   : > { %v1218_v32 = vpop.permute.xlu1 %1217  ;;  %v1226_v41 = vpop.permute.xlu0 %1225 }
 0x252   : > { %1682 = vrot.lane.b32.xlu1 %v1649_v55, %s2985_s24  ;;  %1654 = vrot.lane.b32.xlu0 %v1581_v63, %s2985_s24  ;;  %v1881_v55 = vcombine.high %v4178_v42, %v4722_v14  ;;  %v4746_v63 = vld [vmem:[#allocation11_spill] sm:$0xff]  ;;  %v2347_v42 = vcombine.high %v4193_v53, %v4722_v14  ;;  %v4748_v53 = vld [vmem:[#allocation33_spill] sm:$0xff] }
 0x254   : > { %v4387_v46 = vpop.permute.xlu1 %967  ;;  %v1004_v54 = vpop.permute.xlu0 %1003 }
 0x256   : > { %1920 = vrot.lane.b32.xlu1 %v1880_v1, %s2984_s23  ;;  %1892 = vrot.lane.b32.xlu0 %v1812_v8, %s2984_s23  ;;  %v4747_v1 = vld [vmem:[#allocation12_spill] sm:$0xff] }
 0x258   : > { %v4395_v26 = vpop.permute.xlu1 %1197  ;;  %v1234_v24 = vpop.permute.xlu0 %1233 }
 0x25a   : > { %2393 = vrot.lane.b32.xlu1 %v2346_v7, %s2986_s25  ;;  %2365 = vrot.lane.b32.xlu0 %v2278_v56, %s2986_s25 }
 0x25c   : > { %v4403_v57 = vpop.permute.xlu1 %975  ;;  %v984_v18 = vpop.permute.xlu0 %983 }
 0x25d   : > { %v1017_v37 = vsel %vm769_vm13, %v4743_v36, %v984_v18 }
 0x25e   : > { %2623 = vrot.lane.b32.xlu1 %v2576_v48, %s2986_s25  ;;  %2595 = vrot.lane.b32.xlu0 %v2508_v47, %s2986_s25  ;;  %v1018_v62 = vsel %vm771_vm14, %v1017_v37, %v988_v16  ;;  %v2577_v48 = vcombine.high %v4748_v53, %v4722_v14 }
 0x260   : > { %v4414_v10 = vpop.permute.xlu1 %1205  ;;  %v956_v43 = vpop.permute.xlu0 %955 }
 0x261   : > { %v1010_v38 = vsel %vm769_vm13, %v4745_v40, %v956_v43 }
 0x262   : > { %1690 = vrot.lane.b32.xlu1 %v1650_v20, %s2984_s23  ;;  %1662 = vrot.lane.b32.xlu0 %v1582_v3, %s2984_s23  ;;  %v1011_v4 = vsel %vm771_vm14, %v1010_v38, %v960_v49 }
 0x264   : > { %v1214_v17 = vpop.permute.xlu1 %1213  ;;  %v1186_v16 = vpop.permute.xlu0 %1185 }
 0x265   : > { %v1247_v23 = vsel %vm769_vm13, %v4746_v63, %v1214_v17  ;;  %v1240_v34 = vsel %vm769_vm13, %v4747_v1, %v1186_v16  ;;  %v4750_v1 = vld [vmem:[#allocation4_spill] sm:$0xff] }
 0x266   : > { %1928 = vrot.lane.b32.xlu1 %v1881_v55, %s2986_s25  ;;  %1900 = vrot.lane.b32.xlu0 %v1813_v51, %s2986_s25  ;;  %v1248_v49 = vsel %vm771_vm14, %v1247_v23, %v1218_v32  ;;  %v1241_v8 = vsel %vm771_vm14, %v1240_v34, %v1190_v39  ;;  %v4749_v55 = vld [vmem:[#allocation6_spill] sm:$0xff] }
 0x267   : > { %v712_v51 = vcombine.high %v4749_v55, %v4722_v14 }
 0x268   : > { %v992_v6 = vpop.permute.xlu1 %991  ;;  %v1000_v7 = vpop.permute.xlu0 %999 }
 0x269   : > { %v1019_v12 = vsel %vm773_vm15, %v1018_v62, %v992_v6  ;;  %v2509_v62 = vcombine.high %v4267_v50, %v4722_v14  ;;  %v1583_v50 = vcombine.high %v4216_v27, %v4722_v14  ;;  %v1814_v27 = vcombine.high %v4230_v21, %v4722_v14  ;;  %v4751_v21 = vld [vmem:[#allocation5_spill] sm:$0xff] }
 0x26a   : > { %v1020_v56 = vsel %vm775_vm0, %v1019_v12, %v996_v44  ;;  %2401 = vrot.lane.b32.xlu1 %v2347_v42, %s2987_s28  ;;  %2373 = vrot.lane.b32.xlu0 %v2279_v31, %s2987_s28  ;;  %v4752_v34 = vcombine.high %v4750_v1, %v4751_v21 }
 0x26b   : > { %v1021_v32 = vsel %vm777_vm1, %v1020_v56, %v1000_v7 }
 0x26c   : > { %v1222_v18 = vpop.permute.xlu1 %1221  ;;  %v1230_v39 = vpop.permute.xlu0 %1229  ;;  %v1022_v9 = vsel %vm779_vm2, %v1021_v32, %v1004_v54 }
 0x26d   : > { %v1249_v60 = vsel %vm773_vm15, %v1248_v49, %v1222_v18  ;;  %v640_v49 = vrot.slane %v4752_v34, %v3427_v11 }
 0x26e   : > { %v1250_v44 = vsel %vm775_vm0, %v1249_v60, %v1226_v41  ;;  %1698 = vrot.lane.b32.xlu1 %v1651_v13, %s2986_s25  ;;  %2631 = vrot.lane.b32.xlu0 %v2577_v48, %s2987_s28 }
 0x26f   : > { %v1251_v47 = vsel %vm777_vm1, %v1250_v44, %v1230_v39  ;;  %v644_v11 = vcombine.high %v640_v49, %v4722_v14 }
 0x270   : > { %v964_v36 = vpop.permute.xlu1 %963  ;;  %v1008_v37 = vpop.permute.xlu0 %1007  ;;  %v1252_v54 = vsel %vm779_vm2, %v1251_v47, %v1234_v24  ;;  %v1652_v24 = vcombine.high %v4251_v29, %v4722_v14  ;;  %v1584_v29 = vcombine.high %v4307_v35, %v4722_v14 }
 0x271   : > { %v1012_v43 = vsel %vm773_vm15, %v1011_v4, %v964_v36  ;;  %v4463_v41 = vsel %vm781_vm3, %v1022_v9, %v1008_v37 }
 0x272   : > { %1936 = vrot.lane.b32.xlu1 %v1882_v30, %s2987_s28  ;;  %2603 = vrot.lane.b32.xlu0 %v2509_v62, %s2987_s28  ;;  %v1013_v20 = vsel %vm775_vm0, %v1012_v43, %v4387_v46 }
 0x274   : > { %v1194_v2 = vpop.permute.xlu1 %1193  ;;  %v1238_v3 = vpop.permute.xlu0 %1237 }
 0x275   : > { %v1242_v40 = vsel %vm773_vm15, %v1241_v8, %v1194_v2  ;;  %v1253_v38 = vsel %vm781_vm3, %v1252_v54, %v1238_v3  ;;  %v2656_v8 = vrot.slane %v4365_v15, 4 }
 0x276   : > { %1670 = vrot.lane.b32.xlu1 %v1583_v50, %s2986_s25  ;;  %1706 = vrot.lane.b32.xlu0 %v1652_v24, %s2987_s28  ;;  %v1243_v46 = vsel %vm775_vm0, %v1242_v40, %v4395_v26  ;;  %v4481_v58 = vsel %vm2672_vm4, %v1253_v38, %v2657_v5 }
 0x278   : > { %v972_v4 = vpop.permute.xlu1 %971  ;;  %v1210_v17 = vpop.permute.xlu0 %1209 }
 0x279   : > { %v1014_v16 = vsel %vm777_vm1, %v1013_v20, %v972_v4 }
 0x27a   : > { %1908 = vrot.lane.b32.xlu1 %v1814_v27, %s2987_s28  ;;  %1678 = vrot.lane.b32.xlu0 %v1584_v29, %s2987_s28  ;;  %v1015_v26 = vsel %vm779_vm2, %v1014_v16, %v4403_v57  ;;  %v2682_v57 = vld [vmem:[%s4680_s5] sm:$0xf] }
 0x27c   : > { %v1202_v63 = vpop.permute.xlu1 %1201  ;;  %v2382_v23 = vpop.permute.xlu0 %2381 }
 0x27d   : > { %v1244_v35 = vsel %vm777_vm1, %v1243_v46, %v1202_v63 }
 0x27e   : > { %v1245_v6 = vsel %vm779_vm2, %v1244_v35, %v4414_v10  ;;  %734 = vrot.lane.b32.xlu1 %v640_v49, %s2983_s22  ;;  %766 = vrot.lane.b32.xlu0 %v712_v51, %s2987_s28 }
 0x27f   : > { %v1246_v7 = vsel %vm781_vm3, %v1245_v6, %v1210_v17 }
 0x280   : > { %v980_v42 = vpop.permute.xlu1 %979  ;;  %v2354_v31 = vpop.permute.xlu0 %2353  ;;  %v4510_v12 = vsel %vm2672_vm4, %v1246_v7, %v2656_v8 }
 0x281   : > { %v4513_v15 = vsel %vm781_vm3, %v1015_v26, %v980_v42 }
 0x282   : > { %738 = vrot.lane.b32.xlu1 %v644_v11, %s2987_s28  ;;  %2685 = vperm.xlu0 %2948, %v2682_v57  }
 0x284   : > { %v2612_v10 = vpop.permute.xlu1 %2611  ;;  %v2584_v56 = vpop.permute.xlu0 %2583 }
 0x288   : > { %v1917_v32 = vpop.permute.xlu1 %1916  ;;  %v1889_v18 = vpop.permute.xlu0 %1888 }
 0x28c   : > { %v2390_v39 = vpop.permute.xlu1 %2389  ;;  %v2362_v13 = vpop.permute.xlu0 %2361 }
 0x290   : > { %v2620_v53 = vpop.permute.xlu1 %2619  ;;  %v2592_v48 = vpop.permute.xlu0 %2591 }
 0x294   : > { %v4516_v9 = vpop.permute.xlu1 %1686  ;;  %v4518_v14 = vpop.permute.xlu0 %1658 }
 0x298   : > { %v1925_v60 = vpop.permute.xlu1 %1924  ;;  %v1897_v44 = vpop.permute.xlu0 %1896 }
 0x29c   : > { %v2398_v47 = vpop.permute.xlu1 %2397  ;;  %v2370_v36 = vpop.permute.xlu0 %2369 }
 0x2a0   : > { %v4520_v37 = vpop.permute.xlu1 %2627  ;;  %v4522_v30 = vpop.permute.xlu0 %1666 }
 0x2a4   : > { %v1695_v62 = vpop.permute.xlu1 %1694  ;;  %v4524_v54 = vpop.permute.xlu0 %1904 }
 0x2a8   : > { %v4526_v43 = vpop.permute.xlu1 %1932  ;;  %v4528_v20 = vpop.permute.xlu0 %1702 }
 0x2ac   : > { %v4530_v5 = vpop.permute.xlu1 %2599  ;;  %v2378_v2 = vpop.permute.xlu0 %2377 }
 0x2ad   : > { %v2411_v4 = vsel %vm769_vm13, %v4243_v61, %v2378_v2 }
 0x2ae   : > { %v2412_v29 = vsel %vm771_vm14, %v2411_v4, %v2382_v23 }
 0x2b0   : > { %v4532_v3 = vpop.permute.xlu1 %1674  ;;  %v1913_v50 = vpop.permute.xlu0 %1912 }
 0x2b1   : > { %v1946_v7 = vsel %vm769_vm13, %v4272_v22, %v1913_v50 }
 0x2b2   : > { %v1947_v11 = vsel %vm771_vm14, %v1946_v7, %v1917_v32 }
 0x2b4   : > { %v2350_v24 = vpop.permute.xlu1 %2349  ;;  %v2580_v40 = vpop.permute.xlu0 %2579 }
 0x2b5   : > { %v2404_v17 = vsel %vm769_vm13, %v4289_v0, %v2350_v24  ;;  %v2634_v55 = vsel %vm769_vm13, %v4298_v25, %v2580_v40 }
 0x2b6   : > { %v2405_v16 = vsel %vm771_vm14, %v2404_v17, %v2354_v31  ;;  %v2635_v34 = vsel %vm771_vm14, %v2634_v55, %v2584_v56 }
 0x2b8   : > { %v2608_v38 = vpop.permute.xlu1 %2607  ;;  %v1885_v46 = vpop.permute.xlu0 %1884 }
 0x2b9   : > { %v2641_v51 = vsel %vm769_vm13, %v4325_v19, %v2608_v38  ;;  %v1939_v42 = vsel %vm769_vm13, %v4334_v33, %v1885_v46 }
 0x2ba   : > { %v2642_v21 = vsel %vm771_vm14, %v2641_v51, %v2612_v10  ;;  %v1940_v10 = vsel %vm771_vm14, %v1939_v42, %v1889_v18 }
 0x2bc   : > { %v2386_v27 = vpop.permute.xlu1 %2385  ;;  %v2358_v26 = vpop.permute.xlu0 %2357 }
 0x2bd   : > { %v2413_v63 = vsel %vm773_vm15, %v2412_v29, %v2386_v27  ;;  %v2406_v1 = vsel %vm773_vm15, %v2405_v16, %v2358_v26 }
 0x2be   : > { %v2414_v61 = vsel %vm775_vm0, %v2413_v63, %v2390_v39  ;;  %v2407_v0 = vsel %vm775_vm0, %v2406_v1, %v2362_v13 }
 0x2c0   : > { %v2616_v23 = vpop.permute.xlu1 %2615  ;;  %v2588_v49 = vpop.permute.xlu0 %2587 }
 0x2c1   : > { %v2643_v35 = vsel %vm773_vm15, %v2642_v21, %v2616_v23  ;;  %v2636_v25 = vsel %vm773_vm15, %v2635_v34, %v2588_v49  ;;  %v4753_v23 = vld [vmem:[#allocation18_spill] sm:$0xff]  ;;  %v4754_v34 = vld [vmem:[#allocation7_spill] sm:$0xff] }
 0x2c2   : > { %v2644_v19 = vsel %vm775_vm0, %v2643_v35, %v2620_v53  ;;  %v2637_v8 = vsel %vm775_vm0, %v2636_v25, %v2592_v48  ;;  %v783_v49 = vsel %vm769_vm13, %v4754_v34, %v4753_v23 }
 0x2c4   : > { %v1683_v6 = vpop.permute.xlu1 %1682  ;;  %v1655_v57 = vpop.permute.xlu0 %1654 }
 0x2c5   : > { %v1716_v38 = vsel %vm769_vm13, %v4374_v52, %v1683_v6  ;;  %v4755_v6 = vld [vmem:[#allocation13_spill] sm:$0xff] }
 0x2c8   : > { %v1921_v31 = vpop.permute.xlu1 %1920  ;;  %v1893_v56 = vpop.permute.xlu0 %1892 }
 0x2c9   : > { %v1948_v39 = vsel %vm773_vm15, %v1947_v11, %v1921_v31  ;;  %v1941_v13 = vsel %vm773_vm15, %v1940_v10, %v1893_v56  ;;  %v4756_v11 = vld [vmem:[#allocation19_spill] sm:$0xff] }
 0x2ca   : > { %v1949_v53 = vsel %vm775_vm0, %v1948_v39, %v1925_v60  ;;  %v1942_v48 = vsel %vm775_vm0, %v1941_v13, %v1897_v44  ;;  %v1709_v60 = vsel %vm769_vm13, %v4377_v45, %v1655_v57  ;;  %v1717_v44 = vsel %vm771_vm14, %v1716_v38, %v4516_v9 }
 0x2cb   : > { %v1710_v4 = vsel %vm771_vm14, %v1709_v60, %v4518_v14  ;;  %v4761_v60 = vld [vmem:[#allocation14_spill] sm:$0xff] }
 0x2cc   : > { %v2394_v2 = vpop.permute.xlu1 %2393  ;;  %v2366_v24 = vpop.permute.xlu0 %2365 }
 0x2cd   : > { %v2415_v22 = vsel %vm777_vm1, %v2414_v61, %v2394_v2  ;;  %v2408_v33 = vsel %vm777_vm1, %v2407_v0, %v2366_v24  ;;  %v4758_v24 = vld [vmem:[#allocation20_spill] sm:$0xff] }
 0x2ce   : > { %v2416_v50 = vsel %vm779_vm2, %v2415_v22, %v2398_v47  ;;  %v2409_v32 = vsel %vm779_vm2, %v2408_v33, %v2370_v36  ;;  %v4759_v22 = vld [vmem:[#allocation8_spill] sm:$0xff] }
 0x2cf   : > { %v770_v33 = vsel %vm769_vm13, %v4759_v22, %v4758_v24 }
 0x2d0   : > { %v2624_v18 = vpop.permute.xlu1 %2623  ;;  %v2596_v40 = vpop.permute.xlu0 %2595 }
 0x2d1   : > { %v2645_v14 = vsel %vm777_vm1, %v2644_v19, %v2624_v18  ;;  %v2638_v35 = vsel %vm777_vm1, %v2637_v8, %v2596_v40  ;;  %v4760_v40 = vld [vmem:[#allocation21_spill] sm:$0xff] }
 0x2d2   : > { %v2639_v7 = vsel %vm779_vm2, %v2638_v35, %v4530_v5 }
 0x2d4   : > { %v1691_v46 = vpop.permute.xlu1 %1690  ;;  %v1663_v17 = vpop.permute.xlu0 %1662 }
 0x2d5   : > { %v1718_v47 = vsel %vm773_vm15, %v1717_v44, %v1691_v46  ;;  %v1711_v36 = vsel %vm773_vm15, %v1710_v4, %v1663_v17  ;;  %v772_v44 = vsel %vm771_vm14, %v770_v33, %v4761_v60  ;;  %v4762_v17 = vld [vmem:[#allocation22_spill] sm:$0xff] }
 0x2d6   : > { %v1719_v27 = vsel %vm775_vm0, %v1718_v47, %v1695_v62  ;;  %v1712_v52 = vsel %vm775_vm0, %v1711_v36, %v4522_v30  ;;  %v2646_v30 = vsel %vm779_vm2, %v2645_v14, %v4520_v37  ;;  %v784_v37 = vsel %vm771_vm14, %v783_v49, %v4755_v6 }
 0x2d7   : > { %v785_v10 = vsel %vm773_vm15, %v784_v37, %v4756_v11  ;;  %v774_v47 = vsel %vm773_vm15, %v772_v44, %v4762_v17 }
 0x2d8   : > { %v1929_v29 = vpop.permute.xlu1 %1928  ;;  %v1901_v16 = vpop.permute.xlu0 %1900 }
 0x2d9   : > { %v1943_v45 = vsel %vm777_vm1, %v1942_v48, %v1901_v16  ;;  %v1950_v25 = vsel %vm777_vm1, %v1949_v53, %v1929_v29  ;;  %v4757_v53 = vld [vmem:[#allocation15_spill] sm:$0xff]  ;;  %v4763_v29 = vld [vmem:[#allocation17_spill] sm:$0xff] }
 0x2da   : > { %v1944_v9 = vsel %vm779_vm2, %v1943_v45, %v4524_v54  ;;  %v786_v48 = vsel %vm775_vm0, %v785_v10, %v4757_v53 }
 0x2dc   : > { %v2402_v26 = vpop.permute.xlu1 %2401  ;;  %v2374_v55 = vpop.permute.xlu0 %2373 }
 0x2dd   : > { %v2417_v51 = vsel %vm781_vm3, %v2416_v50, %v2402_v26  ;;  %v2410_v63 = vsel %vm781_vm3, %v2409_v32, %v2374_v55  ;;  %v4764_v55 = vld [vmem:[#allocation16_spill] sm:$0xff] }
 0x2de   : > { %v2669_v1 = vrot.slane %v2417_v51, 4  ;;  %v2668_v62 = vrot.slane %v2410_v63, 4  ;;  %v4765_v51 = vld [vmem:[#allocation23_spill] sm:$0xff]  ;;  %v2650_v63 = vrot.slane %v4513_v15, 4 }
 0x2e0   : > { %v1699_v61 = vpop.permute.xlu1 %1698  ;;  %v2632_v0 = vpop.permute.xlu0 %2631  ;;  %v2680_v21 = vsel %vm2672_vm4, %v4338_v59, %v2669_v1  ;;  %v2679_v54 = vsel %vm2672_vm4, %v4315_v28, %v2668_v62  ;;  %v1951_v59 = vsel %vm779_vm2, %v1950_v25, %v4526_v43 }
 0x2e1   : > { %v2647_v19 = vsel %vm781_vm3, %v2646_v30, %v2632_v0  ;;  %v1720_v42 = vsel %vm777_vm1, %v1719_v27, %v1699_v61  ;;  %v2651_v27 = vrot.slane %v4463_v41, 4  ;;  %v2681_v0 = vld [vmem:[%s4679_s4] sm:$0xf] }
 0x2e2   : > { %2904 = vmatprep.subr.msk.mxu0 %vm2672_vm4, %v2647_v19  ;;  %v1721_v43 = vsel %vm779_vm2, %v1720_v42, %v4528_v20  ;;  %v787_v20 = vsel %vm777_vm1, %v786_v48, %v4760_v40 }
 0x2e3   : > { %v788_v16 = vsel %vm779_vm2, %v787_v20, %v4763_v29 }
 0x2e4   : > { %v1937_v57 = vpop.permute.xlu1 %1936  ;;  %v2604_v28 = vpop.permute.xlu0 %2603 }
 0x2e5   : > { %v1952_v8 = vsel %vm781_vm3, %v1951_v59, %v1937_v57  ;;  %v2640_v31 = vsel %vm781_vm3, %v2639_v7, %v2604_v28 }
 0x2e6   : > { %2905 = vmatpush1.msk.msra.mxu0 %vm2672_vm4, %v2640_v31  ;;  %v2663_v56 = vrot.slane %v1952_v8, 4 }
 0x2e7   : > { %2722 = vmatprep.subr.mxu0 %v2680_v21 }
 0x2e8   : > { %v1671_v39 = vpop.permute.xlu1 %1670  ;;  %2723 = vmatpush1.msra.mxu0 %v2679_v54  ;;  %v1707_v13 = vpop.permute.xlu0 %1706 }
 0x2e9   : > { %v1722_v5 = vsel %vm781_vm3, %v1721_v43, %v1707_v13  ;;  %v1713_v50 = vsel %vm777_vm1, %v1712_v52, %v1671_v39 }
 0x2ea   : > { %v2678_v2 = vsel %vm2672_vm4, %v1722_v5, %v2663_v56  ;;  %v1714_v4 = vsel %vm779_vm2, %v1713_v50, %v4532_v3  ;;  %v776_v3 = vsel %vm775_vm0, %v774_v47, %v4764_v55 }
 0x2eb   : > { %2724 = vmatprep.subr.mxu0 %v2678_v2  ;;  %v778_v41 = vsel %vm777_vm1, %v776_v3, %v4765_v51 }
 0x2ec   : > { %v1909_v32 = vpop.permute.xlu1 %1908  ;;  %v1679_v18 = vpop.permute.xlu0 %1678 }
 0x2ed   : > { %v1945_v38 = vsel %vm781_vm3, %v1944_v9, %v1909_v32  ;;  %v1715_v36 = vsel %vm781_vm3, %v1714_v4, %v1679_v18 }
 0x2ee   : > { %v2662_v46 = vrot.slane %v1945_v38, 4 }
 0x2f0   : > { %v735_v52 = vpop.permute.xlu1 %734  ;;  %v767_v45 = vpop.permute.xlu0 %766  ;;  %v2677_v9 = vsel %vm2672_vm4, %v1715_v36, %v2662_v46 }
 0x2f1   : > { %v789_v26 = vsel %vm781_vm3, %v788_v16, %v767_v45  ;;  %2725 = vmatpush1.msra.mxu0 %v2677_v9  ;;  %v780_v1 = vsel %vm779_vm2, %v778_v41, %v735_v52 }
 0x2f2   : > { %2726 = vmatprep.subr.mxu0 %v4481_v58  ;;  %v2674_v14 = vsel %vm2672_vm4, %v789_v26, %v2651_v27 }
 0x2f3   : > { %2727 = vmatpush1.msra.mxu0 %v4510_v12 }
 0x2f4   : > { %v739_v62 = vpop.permute.xlu1 %738  ;;  %2728 = vmatprep.subr.mxu0 %v2674_v14 }
 0x2f5   : > { %v782_v61 = vsel %vm781_vm3, %v780_v1, %v739_v62 }
 0x2f6   : > { %v2673_v58 = vsel %vm2672_vm4, %v782_v61, %v2650_v63 }
 0x2f7   : > { %2729 = vmatpush1.msra.mxu0 %v2673_v58 }
 0x2f8   : > { %2906 = vmatmul.mubr.msk.f32.vlgmr.msra.gmra.mxu0 %vm2688_vm5, %v2681_v0 }
 0x2fd   : > { %v2686_v12 = vpop.permute.xlu0 %2685 }
 0x3b8   : > { %v2764_v15 = vpop.f32.mrf.mxu0 }
 0x3b9   : > { %v2765_v30 = vadd.f32 %v2764_v15, %v2686_v12 }
 0x3ba   : > { %v2766_v21 = vpop.f32.mrf.mxu0 }
 0x3bb   : > { %v2779_v54 = vmul.f32 %v2765_v30, %v2765_v30  ;;  %v2767_v23 = vadd.f32 %v2766_v21, %v2686_v12  ;;  %v2774_v35 = vsel %vm2672_vm4, %v2765_v30, 0.0 }
 0x3bd   : > { %v2771_v34 = vcombine.low %v2765_v30, %v2767_v23  ;;  %v2780_v49 = vmul.f32 %v2767_v23, %v2767_v23  ;;  %v2775_v25 = vsel %vm2672_vm4, %v2767_v23, 0.0  ;;  %v2781_v6 = vsel %vm2672_vm4, %v2779_v54, 0.0 }
 0x3be   : > { %v2776_v19 = vadd.f32 %v2775_v25, %v2774_v35 }
 0x3bf   : > { %2773 = vst [vmem:[%s350_s16] sm:$0xff] %v2771_v34  ;;  %v2782_v37 = vsel %vm2672_vm4, %v2780_v49, 0.0 }
 0x3c0   : > { %2777 = vadd.xlane.f32.xlu1 %v2776_v19  ;;  %v2783_v57 = vadd.f32 %v2782_v37, %v2781_v6 }
 0x3c2   : > { %2784 = vadd.xlane.f32.xlu0 %v2783_v57 }
 0x449   : > { %v2778_v59 = vpop.xlane.xlu1 %2777 }
 0x44b   : > { %v2785_v28 = vpop.xlane.xlu0 %2784 }
 0x44c   : > { %v2786_v7 = vsel %vm518_vm8, %v2778_v59, %v2785_v28 }
 0x44d   : > { %v2788_v42 = vsel %vm2787_vm6, %v2786_v7, 0.0 }
 0x44e   : > { %2790 = vst.msk [vmem:[%s355_s19] sm:$0xf] %vm2789_vm7, %v2788_v42 }
 0x44f PF: > { %p16_p10 = scmp.ge.s32.totalorder %s3050_s29, 4   ;;  %s4766_s26 = smov %s2968_s27 }
 0x450   : > { %s4767_s27 = smov %s3059_s9  ;;  %s4768_s28 = smov %s3050_s29 }
 0x451   :  { %18 = sbr.rel (!%p16_p10) target bundleno = 4 (0x4), region = 129 }

</bundles_post_ra>
